<compile_context>
chip_gen: v7x
topology: tpu7x:2x2x1
jax: 0.10.0
libtpu: 0.0.40
codegen_flags: <defaults>
</compile_context>

<pallas_src>
import numpy as np
import jax
import jax.numpy as jnp
from jax.experimental import pallas as pl
from jax.experimental.pallas import tpu as pltpu


def _round_up(x, m):
    return (x + m - 1) // m * m


# ----------------------------------------------------------------------------
# Kernel: one (batch-block, time-chunk) grid step of the masked LSTM.
#   lens_ref : (Bblk, 1)      int32 sequence lengths (0 for padded rows)
#   x_ref    : (Bblk, TC*E)   x[b, s*E:(s+1)*E] = embedding at local step s
#   wih_ref  : (E, 4H)        W_ih^T
#   whh_ref  : (H, 4H)        W_hh^T
#   b_ref    : (1, 4H)        b_ih + b_hh
#   out_ref  : (Bblk, TC*H)   masked hidden states (zeros past each length)
#   h/c out  : (Bblk, H)      state at each row's last real timestep
#   gx_sc    : (Bblk, TC*4H)  hoisted per-chunk input projection
#   h_sc/c_sc: (Bblk, H)      recurrent carry across time-chunks
# ----------------------------------------------------------------------------
def _lstm_chunk_kernel(lens_ref, x_ref, wih_ref, whh_ref, b_ref,
                       out_ref, h_out_ref, c_out_ref,
                       gx_sc, h_sc, c_sc):
    Bblk, H = h_out_ref.shape
    G = 4 * H
    TC = out_ref.shape[1] // H
    E = x_ref.shape[1] // TC

    c_idx = pl.program_id(1)                       # time-chunk index (innermost)

    @pl.when(c_idx == 0)
    def _():                                       # new batch block -> zero state
        h_sc[...] = jnp.zeros_like(h_sc)
        c_sc[...] = jnp.zeros_like(c_sc)

    # Hoist weights / bias / lengths out of the step loop; W_hh stays resident
    # in vregs across the whole chunk.
    wih = wih_ref[...]
    whh = whh_ref[...]
    bias = b_ref[...]
    lens = lens_ref[...]                           # (Bblk, 1) int32

    # --- per-chunk input projection, hoisted off the serial recurrence -----
    # TC independent MXU matmuls streamed back-to-back (static offsets, TC is
    # a small static chunk length, so this unroll is bounded by construction).
    for s in range(TC):
        gx_sc[:, s * G:(s + 1) * G] = (
            jnp.dot(x_ref[:, s * E:(s + 1) * E], wih,
                    preferred_element_type=jnp.float32) + bias)

    # --- serial recurrence over the chunk; h/c carried in vregs ------------
    h = h_sc[...]
    c = c_sc[...]
    t0 = c_idx * TC

    for s in range(TC):
        # Only this matmul is on the serial critical path.
        gates = gx_sc[:, s * G:(s + 1) * G] + jnp.dot(
            h, whh, preferred_element_type=jnp.float32)          # (Bblk, 4H)

        if G <= 128:
            # 4H fits one lane group: two full-width EUP pushes + static slices.
            sig = jax.nn.sigmoid(gates)
            th = jnp.tanh(gates)
            i_g = sig[:, 0 * H:1 * H]
            f_g = sig[:, 1 * H:2 * H]
            g_g = th[:, 2 * H:3 * H]
            o_g = sig[:, 3 * H:4 * H]
        else:
            # Large H: transcendentals only on the gates that need them.
            if_g = jax.nn.sigmoid(gates[:, :2 * H])
            i_g = if_g[:, :H]
            f_g = if_g[:, H:]
            g_g = jnp.tanh(gates[:, 2 * H:3 * H])
            o_g = jax.nn.sigmoid(gates[:, 3 * H:])

        c_new = f_g * c + i_g * g_g
        h_new = o_g * jnp.tanh(c_new)

        # Length mask as selects (3 vselects instead of ~6 mul/adds + cast).
        keep = (t0 + s) < lens                                   # (Bblk, 1) bool
        c = jnp.where(keep, c_new, c)
        h = jnp.where(keep, h_new, h)
        out_ref[:, s * H:(s + 1) * H] = jnp.where(keep, h_new, 0.0)

    h_sc[...] = h
    c_sc[...] = c
    # h/c outputs use a constant block index along the chunk axis, so they stay
    # VMEM-resident; the last chunk's write is what lands in HBM.
    h_out_ref[...] = h
    c_out_ref[...] = c


def lstm_encoder_pallas(sent, sent_len, w_ih, w_hh, b_ih, b_hh,
                        *, chunk_target=32, batch_blocks=None):
    """sent: (B, T, E) f32, sent_len: (B,) host int lengths.
    Weights in PyTorch layout: w_ih (4H, E), w_hh (4H, H), biases (4H,).
    Returns (sent_output (B, T_max, H), (h (1, B, H), c (1, B, H)))."""
    sent = jnp.asarray(sent, jnp.float32)
    B, T, E = sent.shape
    H = w_hh.shape[1]
    G = 4 * H

    lens_np = np.asarray(sent_len).astype(np.int32)   # host lengths (as in PyTorch)
    T_eff = max(int(lens_np.max()), 1)                # pad_packed crops to max len

    # Time-chunk length: smallest TC making TC*E and TC*H multiples of 128
    # (lane-dense x / out blocks), capped near `chunk_target`.
    base = int(np.lcm(128 // int(np.gcd(E, 128)), 128 // int(np.gcd(H, 128))))
    TC = min(_round_up(T_eff, base), _round_up(chunk_target, base))
    T_pad = _round_up(T_eff, TC)
    n_chunks = T_pad // TC

    Bp = _round_up(max(B, 8), 8)                      # sublane-aligned batch pad
    if batch_blocks is None:
        # Two "parallel" batch blocks let v7x spread independent rows across
        # both TensorCores; keep one block for small batches.
        batch_blocks = 2 if (Bp >= 16 and Bp % 16 == 0) else 1
    Bblk = Bp // batch_blocks

    # Batch-first, time-flattened layouts: only reshapes, no HBM transposes.
    Tc = min(T, T_pad)
    if (Bp, T_pad) == (B, T):
        x_p = sent
    else:
        x_p = jnp.zeros((Bp, T_pad, E), jnp.float32).at[:B, :Tc].set(sent[:, :Tc])
    x_flat = x_p.reshape(Bp, T_pad * E)

    lens = jnp.zeros((Bp, 1), jnp.int32).at[:B, 0].set(jnp.asarray(lens_np))

    wih_t = jnp.asarray(w_ih, jnp.float32).T                        # (E, 4H)
    whh_t = jnp.asarray(w_hh, jnp.float32).T                        # (H, 4H)
    bias = (jnp.asarray(b_ih, jnp.float32)
            + jnp.asarray(b_hh, jnp.float32)).reshape(1, G)         # (1, 4H)

    out_flat, h_fin, c_fin = pl.pallas_call(
        _lstm_chunk_kernel,
        out_shape=(
            jax.ShapeDtypeStruct((Bp, T_pad * H), jnp.float32),
            jax.ShapeDtypeStruct((Bp, H), jnp.float32),
            jax.ShapeDtypeStruct((Bp, H), jnp.float32),
        ),
        grid_spec=pltpu.PrefetchScalarGridSpec(
            num_scalar_prefetch=0,
            grid=(batch_blocks, n_chunks),            # chunk axis innermost
            in_specs=[
                pl.BlockSpec((Bblk, 1), lambda b, c: (b, 0)),        # lengths
                pl.BlockSpec((Bblk, TC * E), lambda b, c: (b, c)),   # x chunk
                pl.BlockSpec((E, G), lambda b, c: (0, 0)),           # W_ih^T
                pl.BlockSpec((H, G), lambda b, c: (0, 0)),           # W_hh^T
                pl.BlockSpec((1, G), lambda b, c: (0, 0)),           # bias
            ],
            out_specs=[
                pl.BlockSpec((Bblk, TC * H), lambda b, c: (b, c)),   # seq out
                pl.BlockSpec((Bblk, H), lambda b, c: (b, 0)),        # final h
                pl.BlockSpec((Bblk, H), lambda b, c: (b, 0)),        # final c
            ],
            scratch_shapes=[
                pltpu.VMEM((Bblk, TC * G), jnp.float32),   # hoisted gates (chunk)
                pltpu.VMEM((Bblk, H), jnp.float32),        # h carry
                pltpu.VMEM((Bblk, H), jnp.float32),        # c carry
            ],
        ),
        compiler_params=pltpu.CompilerParams(
            dimension_semantics=("parallel", "arbitrary"),
            vmem_limit_bytes=48 * 1024 * 1024),
    )(lens, x_flat, wih_t, whh_t, bias)

    # Reshape-only post-processing (no transpose): crop padding.
    sent_output = out_flat.reshape(Bp, T_pad, H)[:B, :T_eff]
    h = h_fin[:B][None]                                             # (1, B, H)
    c = c_fin[:B][None]                                             # (1, B, H)
    return sent_output, (h, c)


# ----------------------------------------------------------------------------
# Pure-JAX reference (same masked-LSTM math) for a correctness check.
# ----------------------------------------------------------------------------
def lstm_encoder_ref(sent, sent_len, w_ih, w_hh, b_ih, b_hh):
    sent = jnp.asarray(sent, jnp.float32)
    B, T, E = sent.shape
    H = w_hh.shape[1]
    lens = jnp.asarray(np.asarray(sent_len).astype(np.int32))
    Wih = jnp.asarray(w_ih, jnp.float32).T
    Whh = jnp.asarray(w_hh, jnp.float32).T
    b = jnp.asarray(b_ih, jnp.float32) + jnp.asarray(b_hh, jnp.float32)
    h = jnp.zeros((B, H), jnp.float32)
    c = jnp.zeros((B, H), jnp.float32)
    outs = []
    for t in range(T):
        g = sent[:, t] @ Wih + h @ Whh + b
        i_g = jax.nn.sigmoid(g[:, :H])
        f_g = jax.nn.sigmoid(g[:, H:2 * H])
        g_g = jnp.tanh(g[:, 2 * H:3 * H])
        o_g = jax.nn.sigmoid(g[:, 3 * H:])
        c_new = f_g * c + i_g * g_g
        h_new = o_g * jnp.tanh(c_new)
        m = (t < lens)[:, None].astype(jnp.float32)
        c = m * c_new + (1 - m) * c
        h = m * h_new + (1 - m) * h
        outs.append(m * h_new)
    t_max = int(np.asarray(sent_len).max())
    return jnp.stack(outs, 1)[:, :t_max], (h[None], c[None])


def _run_case(B, T, E, H, sent_len, seed_key, chunk_target):
    k_x, k1, k2, k3, k4 = jax.random.split(seed_key, 5)
    sent = jax.random.normal(k_x, (B, T, E), jnp.float32)
    # Deterministic PyTorch-style init: U(-1/sqrt(H), 1/sqrt(H)), gate order i,f,g,o.
    k_scale = 1.0 / np.sqrt(H)
    w_ih = jax.random.uniform(k1, (4 * H, E), jnp.float32, -k_scale, k_scale)
    w_hh = jax.random.uniform(k2, (4 * H, H), jnp.float32, -k_scale, k_scale)
    b_ih = jax.random.uniform(k3, (4 * H,), jnp.float32, -k_scale, k_scale)
    b_hh = jax.random.uniform(k4, (4 * H,), jnp.float32, -k_scale, k_scale)

    out, (h, c) = lstm_encoder_pallas(sent, sent_len, w_ih, w_hh, b_ih, b_hh,
                                      chunk_target=chunk_target)
    jax.block_until_ready((out, h, c))

    out_r, (h_r, c_r) = lstm_encoder_ref(sent, sent_len, w_ih, w_hh, b_ih, b_hh)
    np.testing.assert_allclose(np.asarray(out), np.asarray(out_r), rtol=1e-4, atol=2e-5)
    np.testing.assert_allclose(np.asarray(h), np.asarray(h_r), rtol=1e-4, atol=2e-5)
    np.testing.assert_allclose(np.asarray(c), np.asarray(c_r), rtol=1e-4, atol=2e-5)


if __name__ == "__main__":
    key = jax.random.PRNGKey(0)
    k_a, k_b = jax.random.split(key, 2)

    # Case 1: module-consistent small shapes (bsize=2, embed_dim=32, encod_dim=32,
    # T=8, model='LSTM'); single chunk, single batch block.
    _run_case(B=2, T=8, E=32, H=32,
              sent_len=np.array([8, 5], dtype=np.int64),
              seed_key=k_a, chunk_target=32)

    # Case 2: exercises the chunked time grid (TC=4, several chunks) and the
    # two-way "parallel" batch-block split (Bp=16), plus ragged lengths < T.
    _run_case(B=16, T=13, E=32, H=32,
              sent_len=np.array([13, 12, 11, 10, 9, 8, 7, 6, 5, 4, 3, 2, 1,
                                 13, 7, 1], dtype=np.int64),
              seed_key=k_b, chunk_target=4)

    # TODO(synk): GRU / ReLU-RNN branches of the module are not implemented;
    # only the model='LSTM' path is covered (dropout is a no-op for 1 layer).
    print("KERNEL_OK")
</pallas_src>

<mosaic_0001>
module attributes {stable_mosaic.version = 11 : i64} {
  func.func @_lstm_chunk_kernel(%arg0: i32, %arg1: i32, %arg2: memref<8x1xi32, #tpu.memory_space<vmem>>, %arg3: memref<8x256xf32, #tpu.memory_space<vmem>>, %arg4: memref<32x128xf32, #tpu.memory_space<vmem>>, %arg5: memref<32x128xf32, #tpu.memory_space<vmem>>, %arg6: memref<1x128xf32, #tpu.memory_space<vmem>>, %arg7: memref<8x256xf32, #tpu.memory_space<vmem>>, %arg8: memref<8x32xf32, #tpu.memory_space<vmem>>, %arg9: memref<8x32xf32, #tpu.memory_space<vmem>>, %arg10: memref<8x1024xf32, #tpu.memory_space<vmem>>, %arg11: memref<8x32xf32, #tpu.memory_space<vmem>>, %arg12: memref<8x32xf32, #tpu.memory_space<vmem>>) attributes {dimension_semantics = [#tpu.dimension_semantics<parallel>, #tpu.dimension_semantics<arbitrary>], iteration_bounds = array<i64: 1, 1>, scalar_prefetch = 0 : i64, scratch_operands = 3 : i64, tpu.core_type = #tpu.core_type<tc>, window_params = [{transform_indices = @transform_0, window_bounds = array<i64: 8, 1>}, {transform_indices = @transform_1, window_bounds = array<i64: 8, 256>}, {pipeline_mode = #tpu.pipeline_mode<synchronous>, transform_indices = @transform_2, window_bounds = array<i64: 32, 128>}, {pipeline_mode = #tpu.pipeline_mode<synchronous>, transform_indices = @transform_3, window_bounds = array<i64: 32, 128>}, {pipeline_mode = #tpu.pipeline_mode<synchronous>, transform_indices = @transform_4, window_bounds = array<i64: 1, 128>}, {transform_indices = @transform_5, window_bounds = array<i64: 8, 256>}, {transform_indices = @transform_6, window_bounds = array<i64: 8, 32>}, {transform_indices = @transform_7, window_bounds = array<i64: 8, 32>}]} {
    %c0_i32 = arith.constant 0 : i32
    %0 = arith.cmpi eq, %arg1, %c0_i32 : i32
    %1 = arith.extui %0 : i1 to i32
    %c0_i32_0 = arith.constant 0 : i32
    %2 = arith.cmpi ne, %1, %c0_i32_0 : i32
    scf.if %2 {
      %cst_103 = arith.constant 0.000000e+00 : f32
      %310 = vector.broadcast %cst_103 : f32 to vector<8x32xf32>
      %c0_104 = arith.constant 0 : index
      %c0_105 = arith.constant 0 : index
      %311 = vector.load %arg11[%c0_104, %c0_105] : memref<8x32xf32, #tpu.memory_space<vmem>>, vector<8x32xf32>
      tpu.vector_store %arg11[%c0_104, %c0_105], %310 {strides = array<i32>} : memref<8x32xf32, #tpu.memory_space<vmem>>, vector<8x32xf32>,
      %cst_106 = arith.constant 0.000000e+00 : f32
      %312 = vector.broadcast %cst_106 : f32 to vector<8x32xf32>
      %c0_107 = arith.constant 0 : index
      %c0_108 = arith.constant 0 : index
      %313 = vector.load %arg12[%c0_107, %c0_108] : memref<8x32xf32, #tpu.memory_space<vmem>>, vector<8x32xf32>
      tpu.vector_store %arg12[%c0_107, %c0_108], %312 {strides = array<i32>} : memref<8x32xf32, #tpu.memory_space<vmem>>, vector<8x32xf32>,
    } else {
    }
    %c0 = arith.constant 0 : index
    %c0_1 = arith.constant 0 : index
    %3 = vector.load %arg4[%c0, %c0_1] : memref<32x128xf32, #tpu.memory_space<vmem>>, vector<32x128xf32>
    %c0_2 = arith.constant 0 : index
    %c0_3 = arith.constant 0 : index
    %4 = vector.load %arg5[%c0_2, %c0_3] : memref<32x128xf32, #tpu.memory_space<vmem>>, vector<32x128xf32>
    %c0_4 = arith.constant 0 : index
    %c0_5 = arith.constant 0 : index
    %5 = vector.load %arg6[%c0_4, %c0_5] : memref<1x128xf32, #tpu.memory_space<vmem>>, vector<1x128xf32>
    %c0_6 = arith.constant 0 : index
    %c0_7 = arith.constant 0 : index
    %6 = vector.load %arg2[%c0_6, %c0_7] : memref<8x1xi32, #tpu.memory_space<vmem>>, vector<8x1xi32>
    %c0_8 = arith.constant 0 : index
    %c0_9 = arith.constant 0 : index
    %7 = vector.load %arg3[%c0_8, %c0_9] : memref<8x256xf32, #tpu.memory_space<vmem>>, vector<8x32xf32>
    %cst = arith.constant dense<0.000000e+00> : vector<8x128xf32>
    %8 = tpu.matmul %7, %3, %cst {dimension_numbers = #tpu.dot_dimension_numbers<[1], [0], [0], [1], [0, 0, 1, 1], [], []>} : vector<8x32xf32>, vector<32x128xf32>, vector<8x128xf32> -> vector<8x128xf32>
    %9 = vector.broadcast %5 : vector<1x128xf32> to vector<8x128xf32>
    %10 = arith.addf %8, %9 : vector<8x128xf32>
    %c0_10 = arith.constant 0 : index
    %c0_11 = arith.constant 0 : index
    %11 = vector.load %arg10[%c0_10, %c0_11] : memref<8x1024xf32, #tpu.memory_space<vmem>>, vector<8x128xf32>
    tpu.vector_store %arg10[%c0_10, %c0_11], %10 {strides = array<i32>} : memref<8x1024xf32, #tpu.memory_space<vmem>>, vector<8x128xf32>,
    %c0_12 = arith.constant 0 : index
    %c32 = arith.constant 32 : index
    %12 = vector.load %arg3[%c0_12, %c32] : memref<8x256xf32, #tpu.memory_space<vmem>>, vector<8x32xf32>
    %cst_13 = arith.constant dense<0.000000e+00> : vector<8x128xf32>
    %13 = tpu.matmul %12, %3, %cst_13 {dimension_numbers = #tpu.dot_dimension_numbers<[1], [0], [0], [1], [0, 0, 1, 1], [], []>} : vector<8x32xf32>, vector<32x128xf32>, vector<8x128xf32> -> vector<8x128xf32>
    %14 = vector.broadcast %5 : vector<1x128xf32> to vector<8x128xf32>
    %15 = arith.addf %13, %14 : vector<8x128xf32>
    %c0_14 = arith.constant 0 : index
    %c128 = arith.constant 128 : index
    %16 = vector.load %arg10[%c0_14, %c128] : memref<8x1024xf32, #tpu.memory_space<vmem>>, vector<8x128xf32>
    tpu.vector_store %arg10[%c0_14, %c128], %15 {strides = array<i32>} : memref<8x1024xf32, #tpu.memory_space<vmem>>, vector<8x128xf32>,
    %c0_15 = arith.constant 0 : index
    %c64 = arith.constant 64 : index
    %17 = vector.load %arg3[%c0_15, %c64] : memref<8x256xf32, #tpu.memory_space<vmem>>, vector<8x32xf32>
    %cst_16 = arith.constant dense<0.000000e+00> : vector<8x128xf32>
    %18 = tpu.matmul %17, %3, %cst_16 {dimension_numbers = #tpu.dot_dimension_numbers<[1], [0], [0], [1], [0, 0, 1, 1], [], []>} : vector<8x32xf32>, vector<32x128xf32>, vector<8x128xf32> -> vector<8x128xf32>
    %19 = vector.broadcast %5 : vector<1x128xf32> to vector<8x128xf32>
    %20 = arith.addf %18, %19 : vector<8x128xf32>
    %c0_17 = arith.constant 0 : index
    %c256 = arith.constant 256 : index
    %21 = vector.load %arg10[%c0_17, %c256] : memref<8x1024xf32, #tpu.memory_space<vmem>>, vector<8x128xf32>
    tpu.vector_store %arg10[%c0_17, %c256], %20 {strides = array<i32>} : memref<8x1024xf32, #tpu.memory_space<vmem>>, vector<8x128xf32>,
    %c0_18 = arith.constant 0 : index
    %c96 = arith.constant 96 : index
    %22 = vector.load %arg3[%c0_18, %c96] : memref<8x256xf32, #tpu.memory_space<vmem>>, vector<8x32xf32>
    %cst_19 = arith.constant dense<0.000000e+00> : vector<8x128xf32>
    %23 = tpu.matmul %22, %3, %cst_19 {dimension_numbers = #tpu.dot_dimension_numbers<[1], [0], [0], [1], [0, 0, 1, 1], [], []>} : vector<8x32xf32>, vector<32x128xf32>, vector<8x128xf32> -> vector<8x128xf32>
    %24 = vector.broadcast %5 : vector<1x128xf32> to vector<8x128xf32>
    %25 = arith.addf %23, %24 : vector<8x128xf32>
    %c0_20 = arith.constant 0 : index
    %c384 = arith.constant 384 : index
    %26 = vector.load %arg10[%c0_20, %c384] : memref<8x1024xf32, #tpu.memory_space<vmem>>, vector<8x128xf32>
    tpu.vector_store %arg10[%c0_20, %c384], %25 {strides = array<i32>} : memref<8x1024xf32, #tpu.memory_space<vmem>>, vector<8x128xf32>,
    %c0_21 = arith.constant 0 : index
    %c128_22 = arith.constant 128 : index
    %27 = vector.load %arg3[%c0_21, %c128_22] : memref<8x256xf32, #tpu.memory_space<vmem>>, vector<8x32xf32>
    %cst_23 = arith.constant dense<0.000000e+00> : vector<8x128xf32>
    %28 = tpu.matmul %27, %3, %cst_23 {dimension_numbers = #tpu.dot_dimension_numbers<[1], [0], [0], [1], [0, 0, 1, 1], [], []>} : vector<8x32xf32>, vector<32x128xf32>, vector<8x128xf32> -> vector<8x128xf32>
    %29 = vector.broadcast %5 : vector<1x128xf32> to vector<8x128xf32>
    %30 = arith.addf %28, %29 : vector<8x128xf32>
    %c0_24 = arith.constant 0 : index
    %c512 = arith.constant 512 : index
    %31 = vector.load %arg10[%c0_24, %c512] : memref<8x1024xf32, #tpu.memory_space<vmem>>, vector<8x128xf32>
    tpu.vector_store %arg10[%c0_24, %c512], %30 {strides = array<i32>} : memref<8x1024xf32, #tpu.memory_space<vmem>>, vector<8x128xf32>,
    %c0_25 = arith.constant 0 : index
    %c160 = arith.constant 160 : index
    %32 = vector.load %arg3[%c0_25, %c160] : memref<8x256xf32, #tpu.memory_space<vmem>>, vector<8x32xf32>
    %cst_26 = arith.constant dense<0.000000e+00> : vector<8x128xf32>
    %33 = tpu.matmul %32, %3, %cst_26 {dimension_numbers = #tpu.dot_dimension_numbers<[1], [0], [0], [1], [0, 0, 1, 1], [], []>} : vector<8x32xf32>, vector<32x128xf32>, vector<8x128xf32> -> vector<8x128xf32>
    %34 = vector.broadcast %5 : vector<1x128xf32> to vector<8x128xf32>
    %35 = arith.addf %33, %34 : vector<8x128xf32>
    %c0_27 = arith.constant 0 : index
    %c640 = arith.constant 640 : index
    %36 = vector.load %arg10[%c0_27, %c640] : memref<8x1024xf32, #tpu.memory_space<vmem>>, vector<8x128xf32>
    tpu.vector_store %arg10[%c0_27, %c640], %35 {strides = array<i32>} : memref<8x1024xf32, #tpu.memory_space<vmem>>, vector<8x128xf32>,
    %c0_28 = arith.constant 0 : index
    %c192 = arith.constant 192 : index
    %37 = vector.load %arg3[%c0_28, %c192] : memref<8x256xf32, #tpu.memory_space<vmem>>, vector<8x32xf32>
    %cst_29 = arith.constant dense<0.000000e+00> : vector<8x128xf32>
    %38 = tpu.matmul %37, %3, %cst_29 {dimension_numbers = #tpu.dot_dimension_numbers<[1], [0], [0], [1], [0, 0, 1, 1], [], []>} : vector<8x32xf32>, vector<32x128xf32>, vector<8x128xf32> -> vector<8x128xf32>
    %39 = vector.broadcast %5 : vector<1x128xf32> to vector<8x128xf32>
    %40 = arith.addf %38, %39 : vector<8x128xf32>
    %c0_30 = arith.constant 0 : index
    %c768 = arith.constant 768 : index
    %41 = vector.load %arg10[%c0_30, %c768] : memref<8x1024xf32, #tpu.memory_space<vmem>>, vector<8x128xf32>
    tpu.vector_store %arg10[%c0_30, %c768], %40 {strides = array<i32>} : memref<8x1024xf32, #tpu.memory_space<vmem>>, vector<8x128xf32>,
    %c0_31 = arith.constant 0 : index
    %c224 = arith.constant 224 : index
    %42 = vector.load %arg3[%c0_31, %c224] : memref<8x256xf32, #tpu.memory_space<vmem>>, vector<8x32xf32>
    %cst_32 = arith.constant dense<0.000000e+00> : vector<8x128xf32>
    %43 = tpu.matmul %42, %3, %cst_32 {dimension_numbers = #tpu.dot_dimension_numbers<[1], [0], [0], [1], [0, 0, 1, 1], [], []>} : vector<8x32xf32>, vector<32x128xf32>, vector<8x128xf32> -> vector<8x128xf32>
    %44 = vector.broadcast %5 : vector<1x128xf32> to vector<8x128xf32>
    %45 = arith.addf %43, %44 : vector<8x128xf32>
    %c0_33 = arith.constant 0 : index
    %c896 = arith.constant 896 : index
    %46 = vector.load %arg10[%c0_33, %c896] : memref<8x1024xf32, #tpu.memory_space<vmem>>, vector<8x128xf32>
    tpu.vector_store %arg10[%c0_33, %c896], %45 {strides = array<i32>} : memref<8x1024xf32, #tpu.memory_space<vmem>>, vector<8x128xf32>,
    %c0_34 = arith.constant 0 : index
    %c0_35 = arith.constant 0 : index
    %47 = vector.load %arg11[%c0_34, %c0_35] : memref<8x32xf32, #tpu.memory_space<vmem>>, vector<8x32xf32>
    %c0_36 = arith.constant 0 : index
    %c0_37 = arith.constant 0 : index
    %48 = vector.load %arg12[%c0_36, %c0_37] : memref<8x32xf32, #tpu.memory_space<vmem>>, vector<8x32xf32>
    %c8_i32 = arith.constant 8 : i32
    %49 = arith.muli %arg1, %c8_i32 : i32
    %c0_38 = arith.constant 0 : index
    %c0_39 = arith.constant 0 : index
    %50 = vector.load %arg10[%c0_38, %c0_39] : memref<8x1024xf32, #tpu.memory_space<vmem>>, vector<8x128xf32>
    %cst_40 = arith.constant dense<0.000000e+00> : vector<8x128xf32>
    %51 = tpu.matmul %47, %4, %cst_40 {dimension_numbers = #tpu.dot_dimension_numbers<[1], [0], [0], [1], [0, 0, 1, 1], [], []>} : vector<8x32xf32>, vector<32x128xf32>, vector<8x128xf32> -> vector<8x128xf32>
    %52 = arith.addf %50, %51 : vector<8x128xf32>
    %53 = arith.negf %52 : vector<8x128xf32>
    %54 = math.exp %53 : vector<8x128xf32>
    %cst_41 = arith.constant 1.000000e+00 : f32
    %55 = vector.broadcast %cst_41 : f32 to vector<8x128xf32>
    %56 = arith.addf %55, %54 : vector<8x128xf32>
    %57 = arith.divf %55, %56 : vector<8x128xf32>
    %58 = math.tanh %52 : vector<8x128xf32>
    %59 = vector.extract_strided_slice %57 {offsets = [0, 0], sizes = [8, 32], strides = [1, 1]} : vector<8x128xf32> to vector<8x32xf32>
    %60 = vector.extract_strided_slice %57 {offsets = [0, 32], sizes = [8, 32], strides = [1, 1]} : vector<8x128xf32> to vector<8x32xf32>
    %61 = vector.extract_strided_slice %58 {offsets = [0, 64], sizes = [8, 32], strides = [1, 1]} : vector<8x128xf32> to vector<8x32xf32>
    %62 = vector.extract_strided_slice %57 {offsets = [0, 96], sizes = [8, 32], strides = [1, 1]} : vector<8x128xf32> to vector<8x32xf32>
    %63 = arith.mulf %60, %48 : vector<8x32xf32>
    %64 = arith.mulf %59, %61 : vector<8x32xf32>
    %65 = arith.addf %63, %64 : vector<8x32xf32>
    %66 = math.tanh %65 : vector<8x32xf32>
    %67 = arith.mulf %62, %66 : vector<8x32xf32>
    %c0_i32_42 = arith.constant 0 : i32
    %68 = arith.addi %49, %c0_i32_42 : i32
    %69 = vector.broadcast %68 : i32 to vector<8x1xi32>
    %70 = arith.cmpi slt, %69, %6 : vector<8x1xi32>
    %71 = vector.shape_cast %70 : vector<8x1xi1> to vector<8x1xi1>
    %72 = vector.broadcast %71 : vector<8x1xi1> to vector<8x32xi1>
    %73 = arith.select %72, %65, %48 : vector<8x32xi1>, vector<8x32xf32>
    %74 = vector.shape_cast %70 : vector<8x1xi1> to vector<8x1xi1>
    %75 = vector.broadcast %74 : vector<8x1xi1> to vector<8x32xi1>
    %76 = arith.select %75, %67, %47 : vector<8x32xi1>, vector<8x32xf32>
    %cst_43 = arith.constant 0.000000e+00 : f32
    %77 = vector.shape_cast %70 : vector<8x1xi1> to vector<8x1xi1>
    %78 = vector.broadcast %77 : vector<8x1xi1> to vector<8x32xi1>
    %79 = vector.broadcast %cst_43 : f32 to vector<8x32xf32>
    %80 = arith.select %78, %67, %79 : vector<8x32xi1>, vector<8x32xf32>
    %c0_44 = arith.constant 0 : index
    %c0_45 = arith.constant 0 : index
    %81 = vector.load %arg7[%c0_44, %c0_45] : memref<8x256xf32, #tpu.memory_space<vmem>>, vector<8x32xf32>
    tpu.vector_store %arg7[%c0_44, %c0_45], %80 {strides = array<i32>} : memref<8x256xf32, #tpu.memory_space<vmem>>, vector<8x32xf32>,
    %c0_46 = arith.constant 0 : index
    %c128_47 = arith.constant 128 : index
    %82 = vector.load %arg10[%c0_46, %c128_47] : memref<8x1024xf32, #tpu.memory_space<vmem>>, vector<8x128xf32>
    %cst_48 = arith.constant dense<0.000000e+00> : vector<8x128xf32>
    %83 = tpu.matmul %76, %4, %cst_48 {dimension_numbers = #tpu.dot_dimension_numbers<[1], [0], [0], [1], [0, 0, 1, 1], [], []>} : vector<8x32xf32>, vector<32x128xf32>, vector<8x128xf32> -> vector<8x128xf32>
    %84 = arith.addf %82, %83 : vector<8x128xf32>
    %85 = arith.negf %84 : vector<8x128xf32>
    %86 = math.exp %85 : vector<8x128xf32>
    %cst_49 = arith.constant 1.000000e+00 : f32
    %87 = vector.broadcast %cst_49 : f32 to vector<8x128xf32>
    %88 = arith.addf %87, %86 : vector<8x128xf32>
    %89 = arith.divf %87, %88 : vector<8x128xf32>
    %90 = math.tanh %84 : vector<8x128xf32>
    %91 = vector.extract_strided_slice %89 {offsets = [0, 0], sizes = [8, 32], strides = [1, 1]} : vector<8x128xf32> to vector<8x32xf32>
    %92 = vector.extract_strided_slice %89 {offsets = [0, 32], sizes = [8, 32], strides = [1, 1]} : vector<8x128xf32> to vector<8x32xf32>
    %93 = vector.extract_strided_slice %90 {offsets = [0, 64], sizes = [8, 32], strides = [1, 1]} : vector<8x128xf32> to vector<8x32xf32>
    %94 = vector.extract_strided_slice %89 {offsets = [0, 96], sizes = [8, 32], strides = [1, 1]} : vector<8x128xf32> to vector<8x32xf32>
    %95 = arith.mulf %92, %73 : vector<8x32xf32>
    %96 = arith.mulf %91, %93 : vector<8x32xf32>
    %97 = arith.addf %95, %96 : vector<8x32xf32>
    %98 = math.tanh %97 : vector<8x32xf32>
    %99 = arith.mulf %94, %98 : vector<8x32xf32>
    %c1_i32 = arith.constant 1 : i32
    %100 = arith.addi %49, %c1_i32 : i32
    %101 = vector.broadcast %100 : i32 to vector<8x1xi32>
    %102 = arith.cmpi slt, %101, %6 : vector<8x1xi32>
    %103 = vector.shape_cast %102 : vector<8x1xi1> to vector<8x1xi1>
    %104 = vector.broadcast %103 : vector<8x1xi1> to vector<8x32xi1>
    %105 = arith.select %104, %97, %73 : vector<8x32xi1>, vector<8x32xf32>
    %106 = vector.shape_cast %102 : vector<8x1xi1> to vector<8x1xi1>
    %107 = vector.broadcast %106 : vector<8x1xi1> to vector<8x32xi1>
    %108 = arith.select %107, %99, %76 : vector<8x32xi1>, vector<8x32xf32>
    %cst_50 = arith.constant 0.000000e+00 : f32
    %109 = vector.shape_cast %102 : vector<8x1xi1> to vector<8x1xi1>
    %110 = vector.broadcast %109 : vector<8x1xi1> to vector<8x32xi1>
    %111 = vector.broadcast %cst_50 : f32 to vector<8x32xf32>
    %112 = arith.select %110, %99, %111 : vector<8x32xi1>, vector<8x32xf32>
    %c0_51 = arith.constant 0 : index
    %c32_52 = arith.constant 32 : index
    %113 = vector.load %arg7[%c0_51, %c32_52] : memref<8x256xf32, #tpu.memory_space<vmem>>, vector<8x32xf32>
    tpu.vector_store %arg7[%c0_51, %c32_52], %112 {strides = array<i32>} : memref<8x256xf32, #tpu.memory_space<vmem>>, vector<8x32xf32>,
    %c0_53 = arith.constant 0 : index
    %c256_54 = arith.constant 256 : index
    %114 = vector.load %arg10[%c0_53, %c256_54] : memref<8x1024xf32, #tpu.memory_space<vmem>>, vector<8x128xf32>
    %cst_55 = arith.constant dense<0.000000e+00> : vector<8x128xf32>
    %115 = tpu.matmul %108, %4, %cst_55 {dimension_numbers = #tpu.dot_dimension_numbers<[1], [0], [0], [1], [0, 0, 1, 1], [], []>} : vector<8x32xf32>, vector<32x128xf32>, vector<8x128xf32> -> vector<8x128xf32>
    %116 = arith.addf %114, %115 : vector<8x128xf32>
    %117 = arith.negf %116 : vector<8x128xf32>
    %118 = math.exp %117 : vector<8x128xf32>
    %cst_56 = arith.constant 1.000000e+00 : f32
    %119 = vector.broadcast %cst_56 : f32 to vector<8x128xf32>
    %120 = arith.addf %119, %118 : vector<8x128xf32>
    %121 = arith.divf %119, %120 : vector<8x128xf32>
    %122 = math.tanh %116 : vector<8x128xf32>
    %123 = vector.extract_strided_slice %121 {offsets = [0, 0], sizes = [8, 32], strides = [1, 1]} : vector<8x128xf32> to vector<8x32xf32>
    %124 = vector.extract_strided_slice %121 {offsets = [0, 32], sizes = [8, 32], strides = [1, 1]} : vector<8x128xf32> to vector<8x32xf32>
    %125 = vector.extract_strided_slice %122 {offsets = [0, 64], sizes = [8, 32], strides = [1, 1]} : vector<8x128xf32> to vector<8x32xf32>
    %126 = vector.extract_strided_slice %121 {offsets = [0, 96], sizes = [8, 32], strides = [1, 1]} : vector<8x128xf32> to vector<8x32xf32>
    %127 = arith.mulf %124, %105 : vector<8x32xf32>
    %128 = arith.mulf %123, %125 : vector<8x32xf32>
    %129 = arith.addf %127, %128 : vector<8x32xf32>
    %130 = math.tanh %129 : vector<8x32xf32>
    %131 = arith.mulf %126, %130 : vector<8x32xf32>
    %c2_i32 = arith.constant 2 : i32
    %132 = arith.addi %49, %c2_i32 : i32
    %133 = vector.broadcast %132 : i32 to vector<8x1xi32>
    %134 = arith.cmpi slt, %133, %6 : vector<8x1xi32>
    %135 = vector.shape_cast %134 : vector<8x1xi1> to vector<8x1xi1>
    %136 = vector.broadcast %135 : vector<8x1xi1> to vector<8x32xi1>
    %137 = arith.select %136, %129, %105 : vector<8x32xi1>, vector<8x32xf32>
    %138 = vector.shape_cast %134 : vector<8x1xi1> to vector<8x1xi1>
    %139 = vector.broadcast %138 : vector<8x1xi1> to vector<8x32xi1>
    %140 = arith.select %139, %131, %108 : vector<8x32xi1>, vector<8x32xf32>
    %cst_57 = arith.constant 0.000000e+00 : f32
    %141 = vector.shape_cast %134 : vector<8x1xi1> to vector<8x1xi1>
    %142 = vector.broadcast %141 : vector<8x1xi1> to vector<8x32xi1>
    %143 = vector.broadcast %cst_57 : f32 to vector<8x32xf32>
    %144 = arith.select %142, %131, %143 : vector<8x32xi1>, vector<8x32xf32>
    %c0_58 = arith.constant 0 : index
    %c64_59 = arith.constant 64 : index
    %145 = vector.load %arg7[%c0_58, %c64_59] : memref<8x256xf32, #tpu.memory_space<vmem>>, vector<8x32xf32>
    tpu.vector_store %arg7[%c0_58, %c64_59], %144 {strides = array<i32>} : memref<8x256xf32, #tpu.memory_space<vmem>>, vector<8x32xf32>,
    %c0_60 = arith.constant 0 : index
    %c384_61 = arith.constant 384 : index
    %146 = vector.load %arg10[%c0_60, %c384_61] : memref<8x1024xf32, #tpu.memory_space<vmem>>, vector<8x128xf32>
    %cst_62 = arith.constant dense<0.000000e+00> : vector<8x128xf32>
    %147 = tpu.matmul %140, %4, %cst_62 {dimension_numbers = #tpu.dot_dimension_numbers<[1], [0], [0], [1], [0, 0, 1, 1], [], []>} : vector<8x32xf32>, vector<32x128xf32>, vector<8x128xf32> -> vector<8x128xf32>
    %148 = arith.addf %146, %147 : vector<8x128xf32>
    %149 = arith.negf %148 : vector<8x128xf32>
    %150 = math.exp %149 : vector<8x128xf32>
    %cst_63 = arith.constant 1.000000e+00 : f32
    %151 = vector.broadcast %cst_63 : f32 to vector<8x128xf32>
    %152 = arith.addf %151, %150 : vector<8x128xf32>
    %153 = arith.divf %151, %152 : vector<8x128xf32>
    %154 = math.tanh %148 : vector<8x128xf32>
    %155 = vector.extract_strided_slice %153 {offsets = [0, 0], sizes = [8, 32], strides = [1, 1]} : vector<8x128xf32> to vector<8x32xf32>
    %156 = vector.extract_strided_slice %153 {offsets = [0, 32], sizes = [8, 32], strides = [1, 1]} : vector<8x128xf32> to vector<8x32xf32>
    %157 = vector.extract_strided_slice %154 {offsets = [0, 64], sizes = [8, 32], strides = [1, 1]} : vector<8x128xf32> to vector<8x32xf32>
    %158 = vector.extract_strided_slice %153 {offsets = [0, 96], sizes = [8, 32], strides = [1, 1]} : vector<8x128xf32> to vector<8x32xf32>
    %159 = arith.mulf %156, %137 : vector<8x32xf32>
    %160 = arith.mulf %155, %157 : vector<8x32xf32>
    %161 = arith.addf %159, %160 : vector<8x32xf32>
    %162 = math.tanh %161 : vector<8x32xf32>
    %163 = arith.mulf %158, %162 : vector<8x32xf32>
    %c3_i32 = arith.constant 3 : i32
    %164 = arith.addi %49, %c3_i32 : i32
    %165 = vector.broadcast %164 : i32 to vector<8x1xi32>
    %166 = arith.cmpi slt, %165, %6 : vector<8x1xi32>
    %167 = vector.shape_cast %166 : vector<8x1xi1> to vector<8x1xi1>
    %168 = vector.broadcast %167 : vector<8x1xi1> to vector<8x32xi1>
    %169 = arith.select %168, %161, %137 : vector<8x32xi1>, vector<8x32xf32>
    %170 = vector.shape_cast %166 : vector<8x1xi1> to vector<8x1xi1>
    %171 = vector.broadcast %170 : vector<8x1xi1> to vector<8x32xi1>
    %172 = arith.select %171, %163, %140 : vector<8x32xi1>, vector<8x32xf32>
    %cst_64 = arith.constant 0.000000e+00 : f32
    %173 = vector.shape_cast %166 : vector<8x1xi1> to vector<8x1xi1>
    %174 = vector.broadcast %173 : vector<8x1xi1> to vector<8x32xi1>
    %175 = vector.broadcast %cst_64 : f32 to vector<8x32xf32>
    %176 = arith.select %174, %163, %175 : vector<8x32xi1>, vector<8x32xf32>
    %c0_65 = arith.constant 0 : index
    %c96_66 = arith.constant 96 : index
    %177 = vector.load %arg7[%c0_65, %c96_66] : memref<8x256xf32, #tpu.memory_space<vmem>>, vector<8x32xf32>
    tpu.vector_store %arg7[%c0_65, %c96_66], %176 {strides = array<i32>} : memref<8x256xf32, #tpu.memory_space<vmem>>, vector<8x32xf32>,
    %c0_67 = arith.constant 0 : index
    %c512_68 = arith.constant 512 : index
    %178 = vector.load %arg10[%c0_67, %c512_68] : memref<8x1024xf32, #tpu.memory_space<vmem>>, vector<8x128xf32>
    %cst_69 = arith.constant dense<0.000000e+00> : vector<8x128xf32>
    %179 = tpu.matmul %172, %4, %cst_69 {dimension_numbers = #tpu.dot_dimension_numbers<[1], [0], [0], [1], [0, 0, 1, 1], [], []>} : vector<8x32xf32>, vector<32x128xf32>, vector<8x128xf32> -> vector<8x128xf32>
    %180 = arith.addf %178, %179 : vector<8x128xf32>
    %181 = arith.negf %180 : vector<8x128xf32>
    %182 = math.exp %181 : vector<8x128xf32>
    %cst_70 = arith.constant 1.000000e+00 : f32
    %183 = vector.broadcast %cst_70 : f32 to vector<8x128xf32>
    %184 = arith.addf %183, %182 : vector<8x128xf32>
    %185 = arith.divf %183, %184 : vector<8x128xf32>
    %186 = math.tanh %180 : vector<8x128xf32>
    %187 = vector.extract_strided_slice %185 {offsets = [0, 0], sizes = [8, 32], strides = [1, 1]} : vector<8x128xf32> to vector<8x32xf32>
    %188 = vector.extract_strided_slice %185 {offsets = [0, 32], sizes = [8, 32], strides = [1, 1]} : vector<8x128xf32> to vector<8x32xf32>
    %189 = vector.extract_strided_slice %186 {offsets = [0, 64], sizes = [8, 32], strides = [1, 1]} : vector<8x128xf32> to vector<8x32xf32>
    %190 = vector.extract_strided_slice %185 {offsets = [0, 96], sizes = [8, 32], strides = [1, 1]} : vector<8x128xf32> to vector<8x32xf32>
    %191 = arith.mulf %188, %169 : vector<8x32xf32>
    %192 = arith.mulf %187, %189 : vector<8x32xf32>
    %193 = arith.addf %191, %192 : vector<8x32xf32>
    %194 = math.tanh %193 : vector<8x32xf32>
    %195 = arith.mulf %190, %194 : vector<8x32xf32>
    %c4_i32 = arith.constant 4 : i32
    %196 = arith.addi %49, %c4_i32 : i32
    %197 = vector.broadcast %196 : i32 to vector<8x1xi32>
    %198 = arith.cmpi slt, %197, %6 : vector<8x1xi32>
    %199 = vector.shape_cast %198 : vector<8x1xi1> to vector<8x1xi1>
    %200 = vector.broadcast %199 : vector<8x1xi1> to vector<8x32xi1>
    %201 = arith.select %200, %193, %169 : vector<8x32xi1>, vector<8x32xf32>
    %202 = vector.shape_cast %198 : vector<8x1xi1> to vector<8x1xi1>
    %203 = vector.broadcast %202 : vector<8x1xi1> to vector<8x32xi1>
    %204 = arith.select %203, %195, %172 : vector<8x32xi1>, vector<8x32xf32>
    %cst_71 = arith.constant 0.000000e+00 : f32
    %205 = vector.shape_cast %198 : vector<8x1xi1> to vector<8x1xi1>
    %206 = vector.broadcast %205 : vector<8x1xi1> to vector<8x32xi1>
    %207 = vector.broadcast %cst_71 : f32 to vector<8x32xf32>
    %208 = arith.select %206, %195, %207 : vector<8x32xi1>, vector<8x32xf32>
    %c0_72 = arith.constant 0 : index
    %c128_73 = arith.constant 128 : index
    %209 = vector.load %arg7[%c0_72, %c128_73] : memref<8x256xf32, #tpu.memory_space<vmem>>, vector<8x32xf32>
    tpu.vector_store %arg7[%c0_72, %c128_73], %208 {strides = array<i32>} : memref<8x256xf32, #tpu.memory_space<vmem>>, vector<8x32xf32>,
    %c0_74 = arith.constant 0 : index
    %c640_75 = arith.constant 640 : index
    %210 = vector.load %arg10[%c0_74, %c640_75] : memref<8x1024xf32, #tpu.memory_space<vmem>>, vector<8x128xf32>
    %cst_76 = arith.constant dense<0.000000e+00> : vector<8x128xf32>
    %211 = tpu.matmul %204, %4, %cst_76 {dimension_numbers = #tpu.dot_dimension_numbers<[1], [0], [0], [1], [0, 0, 1, 1], [], []>} : vector<8x32xf32>, vector<32x128xf32>, vector<8x128xf32> -> vector<8x128xf32>
    %212 = arith.addf %210, %211 : vector<8x128xf32>
    %213 = arith.negf %212 : vector<8x128xf32>
    %214 = math.exp %213 : vector<8x128xf32>
    %cst_77 = arith.constant 1.000000e+00 : f32
    %215 = vector.broadcast %cst_77 : f32 to vector<8x128xf32>
    %216 = arith.addf %215, %214 : vector<8x128xf32>
    %217 = arith.divf %215, %216 : vector<8x128xf32>
    %218 = math.tanh %212 : vector<8x128xf32>
    %219 = vector.extract_strided_slice %217 {offsets = [0, 0], sizes = [8, 32], strides = [1, 1]} : vector<8x128xf32> to vector<8x32xf32>
    %220 = vector.extract_strided_slice %217 {offsets = [0, 32], sizes = [8, 32], strides = [1, 1]} : vector<8x128xf32> to vector<8x32xf32>
    %221 = vector.extract_strided_slice %218 {offsets = [0, 64], sizes = [8, 32], strides = [1, 1]} : vector<8x128xf32> to vector<8x32xf32>
    %222 = vector.extract_strided_slice %217 {offsets = [0, 96], sizes = [8, 32], strides = [1, 1]} : vector<8x128xf32> to vector<8x32xf32>
    %223 = arith.mulf %220, %201 : vector<8x32xf32>
    %224 = arith.mulf %219, %221 : vector<8x32xf32>
    %225 = arith.addf %223, %224 : vector<8x32xf32>
    %226 = math.tanh %225 : vector<8x32xf32>
    %227 = arith.mulf %222, %226 : vector<8x32xf32>
    %c5_i32 = arith.constant 5 : i32
    %228 = arith.addi %49, %c5_i32 : i32
    %229 = vector.broadcast %228 : i32 to vector<8x1xi32>
    %230 = arith.cmpi slt, %229, %6 : vector<8x1xi32>
    %231 = vector.shape_cast %230 : vector<8x1xi1> to vector<8x1xi1>
    %232 = vector.broadcast %231 : vector<8x1xi1> to vector<8x32xi1>
    %233 = arith.select %232, %225, %201 : vector<8x32xi1>, vector<8x32xf32>
    %234 = vector.shape_cast %230 : vector<8x1xi1> to vector<8x1xi1>
    %235 = vector.broadcast %234 : vector<8x1xi1> to vector<8x32xi1>
    %236 = arith.select %235, %227, %204 : vector<8x32xi1>, vector<8x32xf32>
    %cst_78 = arith.constant 0.000000e+00 : f32
    %237 = vector.shape_cast %230 : vector<8x1xi1> to vector<8x1xi1>
    %238 = vector.broadcast %237 : vector<8x1xi1> to vector<8x32xi1>
    %239 = vector.broadcast %cst_78 : f32 to vector<8x32xf32>
    %240 = arith.select %238, %227, %239 : vector<8x32xi1>, vector<8x32xf32>
    %c0_79 = arith.constant 0 : index
    %c160_80 = arith.constant 160 : index
    %241 = vector.load %arg7[%c0_79, %c160_80] : memref<8x256xf32, #tpu.memory_space<vmem>>, vector<8x32xf32>
    tpu.vector_store %arg7[%c0_79, %c160_80], %240 {strides = array<i32>} : memref<8x256xf32, #tpu.memory_space<vmem>>, vector<8x32xf32>,
    %c0_81 = arith.constant 0 : index
    %c768_82 = arith.constant 768 : index
    %242 = vector.load %arg10[%c0_81, %c768_82] : memref<8x1024xf32, #tpu.memory_space<vmem>>, vector<8x128xf32>
    %cst_83 = arith.constant dense<0.000000e+00> : vector<8x128xf32>
    %243 = tpu.matmul %236, %4, %cst_83 {dimension_numbers = #tpu.dot_dimension_numbers<[1], [0], [0], [1], [0, 0, 1, 1], [], []>} : vector<8x32xf32>, vector<32x128xf32>, vector<8x128xf32> -> vector<8x128xf32>
    %244 = arith.addf %242, %243 : vector<8x128xf32>
    %245 = arith.negf %244 : vector<8x128xf32>
    %246 = math.exp %245 : vector<8x128xf32>
    %cst_84 = arith.constant 1.000000e+00 : f32
    %247 = vector.broadcast %cst_84 : f32 to vector<8x128xf32>
    %248 = arith.addf %247, %246 : vector<8x128xf32>
    %249 = arith.divf %247, %248 : vector<8x128xf32>
    %250 = math.tanh %244 : vector<8x128xf32>
    %251 = vector.extract_strided_slice %249 {offsets = [0, 0], sizes = [8, 32], strides = [1, 1]} : vector<8x128xf32> to vector<8x32xf32>
    %252 = vector.extract_strided_slice %249 {offsets = [0, 32], sizes = [8, 32], strides = [1, 1]} : vector<8x128xf32> to vector<8x32xf32>
    %253 = vector.extract_strided_slice %250 {offsets = [0, 64], sizes = [8, 32], strides = [1, 1]} : vector<8x128xf32> to vector<8x32xf32>
    %254 = vector.extract_strided_slice %249 {offsets = [0, 96], sizes = [8, 32], strides = [1, 1]} : vector<8x128xf32> to vector<8x32xf32>
    %255 = arith.mulf %252, %233 : vector<8x32xf32>
    %256 = arith.mulf %251, %253 : vector<8x32xf32>
    %257 = arith.addf %255, %256 : vector<8x32xf32>
    %258 = math.tanh %257 : vector<8x32xf32>
    %259 = arith.mulf %254, %258 : vector<8x32xf32>
    %c6_i32 = arith.constant 6 : i32
    %260 = arith.addi %49, %c6_i32 : i32
    %261 = vector.broadcast %260 : i32 to vector<8x1xi32>
    %262 = arith.cmpi slt, %261, %6 : vector<8x1xi32>
    %263 = vector.shape_cast %262 : vector<8x1xi1> to vector<8x1xi1>
    %264 = vector.broadcast %263 : vector<8x1xi1> to vector<8x32xi1>
    %265 = arith.select %264, %257, %233 : vector<8x32xi1>, vector<8x32xf32>
    %266 = vector.shape_cast %262 : vector<8x1xi1> to vector<8x1xi1>
    %267 = vector.broadcast %266 : vector<8x1xi1> to vector<8x32xi1>
    %268 = arith.select %267, %259, %236 : vector<8x32xi1>, vector<8x32xf32>
    %cst_85 = arith.constant 0.000000e+00 : f32
    %269 = vector.shape_cast %262 : vector<8x1xi1> to vector<8x1xi1>
    %270 = vector.broadcast %269 : vector<8x1xi1> to vector<8x32xi1>
    %271 = vector.broadcast %cst_85 : f32 to vector<8x32xf32>
    %272 = arith.select %270, %259, %271 : vector<8x32xi1>, vector<8x32xf32>
    %c0_86 = arith.constant 0 : index
    %c192_87 = arith.constant 192 : index
    %273 = vector.load %arg7[%c0_86, %c192_87] : memref<8x256xf32, #tpu.memory_space<vmem>>, vector<8x32xf32>
    tpu.vector_store %arg7[%c0_86, %c192_87], %272 {strides = array<i32>} : memref<8x256xf32, #tpu.memory_space<vmem>>, vector<8x32xf32>,
    %c0_88 = arith.constant 0 : index
    %c896_89 = arith.constant 896 : index
    %274 = vector.load %arg10[%c0_88, %c896_89] : memref<8x1024xf32, #tpu.memory_space<vmem>>, vector<8x128xf32>
    %cst_90 = arith.constant dense<0.000000e+00> : vector<8x128xf32>
    %275 = tpu.matmul %268, %4, %cst_90 {dimension_numbers = #tpu.dot_dimension_numbers<[1], [0], [0], [1], [0, 0, 1, 1], [], []>} : vector<8x32xf32>, vector<32x128xf32>, vector<8x128xf32> -> vector<8x128xf32>
    %276 = arith.addf %274, %275 : vector<8x128xf32>
    %277 = arith.negf %276 : vector<8x128xf32>
    %278 = math.exp %277 : vector<8x128xf32>
    %cst_91 = arith.constant 1.000000e+00 : f32
    %279 = vector.broadcast %cst_91 : f32 to vector<8x128xf32>
    %280 = arith.addf %279, %278 : vector<8x128xf32>
    %281 = arith.divf %279, %280 : vector<8x128xf32>
    %282 = math.tanh %276 : vector<8x128xf32>
    %283 = vector.extract_strided_slice %281 {offsets = [0, 0], sizes = [8, 32], strides = [1, 1]} : vector<8x128xf32> to vector<8x32xf32>
    %284 = vector.extract_strided_slice %281 {offsets = [0, 32], sizes = [8, 32], strides = [1, 1]} : vector<8x128xf32> to vector<8x32xf32>
    %285 = vector.extract_strided_slice %282 {offsets = [0, 64], sizes = [8, 32], strides = [1, 1]} : vector<8x128xf32> to vector<8x32xf32>
    %286 = vector.extract_strided_slice %281 {offsets = [0, 96], sizes = [8, 32], strides = [1, 1]} : vector<8x128xf32> to vector<8x32xf32>
    %287 = arith.mulf %284, %265 : vector<8x32xf32>
    %288 = arith.mulf %283, %285 : vector<8x32xf32>
    %289 = arith.addf %287, %288 : vector<8x32xf32>
    %290 = math.tanh %289 : vector<8x32xf32>
    %291 = arith.mulf %286, %290 : vector<8x32xf32>
    %c7_i32 = arith.constant 7 : i32
    %292 = arith.addi %49, %c7_i32 : i32
    %293 = vector.broadcast %292 : i32 to vector<8x1xi32>
    %294 = arith.cmpi slt, %293, %6 : vector<8x1xi32>
    %295 = vector.shape_cast %294 : vector<8x1xi1> to vector<8x1xi1>
    %296 = vector.broadcast %295 : vector<8x1xi1> to vector<8x32xi1>
    %297 = arith.select %296, %289, %265 : vector<8x32xi1>, vector<8x32xf32>
    %298 = vector.shape_cast %294 : vector<8x1xi1> to vector<8x1xi1>
    %299 = vector.broadcast %298 : vector<8x1xi1> to vector<8x32xi1>
    %300 = arith.select %299, %291, %268 : vector<8x32xi1>, vector<8x32xf32>
    %cst_92 = arith.constant 0.000000e+00 : f32
    %301 = vector.shape_cast %294 : vector<8x1xi1> to vector<8x1xi1>
    %302 = vector.broadcast %301 : vector<8x1xi1> to vector<8x32xi1>
    %303 = vector.broadcast %cst_92 : f32 to vector<8x32xf32>
    %304 = arith.select %302, %291, %303 : vector<8x32xi1>, vector<8x32xf32>
    %c0_93 = arith.constant 0 : index
    %c224_94 = arith.constant 224 : index
    %305 = vector.load %arg7[%c0_93, %c224_94] : memref<8x256xf32, #tpu.memory_space<vmem>>, vector<8x32xf32>
    tpu.vector_store %arg7[%c0_93, %c224_94], %304 {strides = array<i32>} : memref<8x256xf32, #tpu.memory_space<vmem>>, vector<8x32xf32>,
    %c0_95 = arith.constant 0 : index
    %c0_96 = arith.constant 0 : index
    %306 = vector.load %arg11[%c0_95, %c0_96] : memref<8x32xf32, #tpu.memory_space<vmem>>, vector<8x32xf32>
    tpu.vector_store %arg11[%c0_95, %c0_96], %300 {strides = array<i32>} : memref<8x32xf32, #tpu.memory_space<vmem>>, vector<8x32xf32>,
    %c0_97 = arith.constant 0 : index
    %c0_98 = arith.constant 0 : index
    %307 = vector.load %arg12[%c0_97, %c0_98] : memref<8x32xf32, #tpu.memory_space<vmem>>, vector<8x32xf32>
    tpu.vector_store %arg12[%c0_97, %c0_98], %297 {strides = array<i32>} : memref<8x32xf32, #tpu.memory_space<vmem>>, vector<8x32xf32>,
    %c0_99 = arith.constant 0 : index
    %c0_100 = arith.constant 0 : index
    %308 = vector.load %arg8[%c0_99, %c0_100] : memref<8x32xf32, #tpu.memory_space<vmem>>, vector<8x32xf32>
    tpu.vector_store %arg8[%c0_99, %c0_100], %300 {strides = array<i32>} : memref<8x32xf32, #tpu.memory_space<vmem>>, vector<8x32xf32>,
    %c0_101 = arith.constant 0 : index
    %c0_102 = arith.constant 0 : index
    %309 = vector.load %arg9[%c0_101, %c0_102] : memref<8x32xf32, #tpu.memory_space<vmem>>, vector<8x32xf32>
    tpu.vector_store %arg9[%c0_101, %c0_102], %297 {strides = array<i32>} : memref<8x32xf32, #tpu.memory_space<vmem>>, vector<8x32xf32>,
    return
  }
  func.func @transform_0(%arg0: i32, %arg1: i32) -> (i32, i32) {
    %c0_i32 = arith.constant 0 : i32
    %c0_i32_0 = arith.constant 0 : i32
    return %arg0, %c0_i32 : i32, i32
  }
  func.func @transform_1(%arg0: i32, %arg1: i32) -> (i32, i32) {
    %c0_i32 = arith.constant 0 : i32
    return %arg0, %arg1 : i32, i32
  }
  func.func @transform_2(%arg0: i32, %arg1: i32) -> (i32, i32) {
    %c0_i32 = arith.constant 0 : i32
    %c0_i32_0 = arith.constant 0 : i32
    %c0_i32_1 = arith.constant 0 : i32
    return %c0_i32, %c0_i32_0 : i32, i32
  }
  func.func @transform_3(%arg0: i32, %arg1: i32) -> (i32, i32) {
    %c0_i32 = arith.constant 0 : i32
    %c0_i32_0 = arith.constant 0 : i32
    %c0_i32_1 = arith.constant 0 : i32
    return %c0_i32, %c0_i32_0 : i32, i32
  }
  func.func @transform_4(%arg0: i32, %arg1: i32) -> (i32, i32) {
    %c0_i32 = arith.constant 0 : i32
    %c0_i32_0 = arith.constant 0 : i32
    %c0_i32_1 = arith.constant 0 : i32
    return %c0_i32, %c0_i32_0 : i32, i32
  }
  func.func @transform_5(%arg0: i32, %arg1: i32) -> (i32, i32) {
    %c0_i32 = arith.constant 0 : i32
    return %arg0, %arg1 : i32, i32
  }
  func.func @transform_6(%arg0: i32, %arg1: i32) -> (i32, i32) {
    %c0_i32 = arith.constant 0 : i32
    %c0_i32_0 = arith.constant 0 : i32
    return %arg0, %c0_i32 : i32, i32
  }
  func.func @transform_7(%arg0: i32, %arg1: i32) -> (i32, i32) {
    %c0_i32 = arith.constant 0 : i32
    %c0_i32_0 = arith.constant 0 : i32
    return %arg0, %c0_i32 : i32, i32
  }
}

</mosaic_0001>

<bundles_post_ra>
// kernel: tpu_custom_call.1
= control target key start
LH: loop header
LB: loop body
LE: loop exit
PB: predicated region body
PF: predicated region fallthrough
CT: control target
= control target key end

     0   :  { %13 = vsyncpa [#allocation6], 0  ;;  %s2780_s0 = inlined_call_operand.vmem [shape: s32[8,1], index: 0, kind: input, shape index: {}]   ;;  %s2781_s1 = inlined_call_operand.hbm [shape: f32[8,256], index: 1, kind: input, shape index: {}]   ;;  %s2782_s2 = inlined_call_operand.hbm [shape: f32[32,128], index: 2, kind: input, shape index: {}]   ;;  %s2783_s3 = inlined_call_operand.hbm [shape: f32[32,128], index: 3, kind: input, shape index: {}]   ;;  %s2784_s4 = inlined_call_operand.vmem [shape: f32[1,128], index: 4, kind: input, shape index: {}]   ;;  %s2785_s5 = inlined_call_operand.hbm [shape: f32[8,256], index: 5, kind: output, shape index: {0}]   ;;  %s2786_s6 = inlined_call_operand.hbm [shape: f32[8,32], index: 6, kind: output, shape index: {1}]   ;;  %s2787_s7 = inlined_call_operand.hbm [shape: f32[8,32], index: 7, kind: output, shape index: {2}]  }
   0x1   :  { %14 = vsyncpa [#allocation9], 0 }
   0x2   :  { %15 = vsyncpa [#allocation7], 0 }
   0x3   :  { %16 = vsyncpa [#allocation13], 0  ;;  %s2323_s24 = smov [#allocation8]   ;;  %s2183_s28 = scalar_lea.hbm %s2782_s2, 512 }
   0x4   :  { %s34_s25 = sshll.u32 %s2323_s24, 4  ;;  %p2184_p0 = scmp.ne.s32.totalorder %s2782_s2, %s2183_s28  ;;  %s35_s25 = int_to_ptr.vmem [resolvable:$true] %s34_s25 }
   0x5   :  { %p2187_p1 = scmp.lt.u32.totalorder %s2183_s28, %s2782_s2 }
   0x7   :  { %p2189_p2 = pnand %p2187_p1, %p2184_p0 }
   0x9   :  { %2192 = shalt.err (!%p2189_p2)
}
   0xa   :  { %s2193_s10 = scalar_lea.vmem %s35_s25, 512  ;;  %p2198_p4 = scmp.lt.s32.totalorder %s35_s25, %s35_s25 }
   0xb   :  { %p2194_p3 = scmp.ne.s32.totalorder %s35_s25, %s2193_s10  ;;  %p2199_p5 = scmp.lt.s32.totalorder %s2193_s10, %s2193_s10 }
   0xd   :  { %p2200_p6 = por %p2199_p5, %p2198_p4 }
   0xf   :  { %p2201_p7 = pnand %p2200_p6, %p2194_p3 }
  0x11   :  { %2204 = shalt.err (!%p2201_p7)
}
  0x12   :  { %s2324_s11 = smov 128   ;;  %s2325_s12 = smov 8  }
  0x13   :  { %40 = dma.hbm_to_vmem [thread:$0]  %s2782_s2, 512, %s35_s25, [#allocation9], %s2324_s11, %s2324_s11, %s2325_s12  }
  0x14   :  { %s2326_s15 = smov [#allocation5]   ;;  %s2327_s17 = smov [#allocation10]  }
  0x15   :  { %s25_s16 = sshll.u32 %s2326_s15, 4  ;;  %s46_s18 = sshll.u32 %s2327_s17, 4  ;;  %s26_s16 = int_to_ptr.vmem [resolvable:$true] %s25_s16  ;;  %s47_s18 = int_to_ptr.vmem [resolvable:$true] %s46_s18 }
  0x16   :  { %s2205_s21 = scalar_lea.hbm %s2781_s1, 256 }
  0x17   :  { %p2206_p8 = scmp.ne.s32.totalorder %s2781_s1, %s2205_s21  ;;  %p2209_p9 = scmp.lt.u32.totalorder %s2205_s21, %s2781_s1 }
  0x19   :  { %p2211_p10 = pnand %p2209_p9, %p2206_p8 }
  0x1b   :  { %2214 = shalt.err (!%p2211_p10)
}
  0x1c   :  { %s2215_s2 = scalar_lea.vmem %s26_s16, 256  ;;  %p2220_p12 = scmp.lt.s32.totalorder %s26_s16, %s26_s16 }
  0x1d   :  { %p2216_p11 = scmp.ne.s32.totalorder %s26_s16, %s2215_s2  ;;  %p2221_p13 = scmp.lt.s32.totalorder %s2215_s2, %s2215_s2 }
  0x1f   :  { %p2222_p0 = por %p2221_p13, %p2220_p12 }
  0x21   :  { %p2223_p1 = pnand %p2222_p0, %p2216_p11 }
  0x23   :  { %2226 = shalt.err (!%p2223_p1)
}
  0x24   :  { %28 = dma.hbm_to_vmem [thread:$0]  %s2781_s1, 256, %s26_s16, [#allocation6]  }
  0x25   :  { %s2227_s30 = scalar_lea.hbm %s2783_s3, 512 }
  0x26   :  { %p2228_p2 = scmp.ne.s32.totalorder %s2783_s3, %s2227_s30  ;;  %p2231_p3 = scmp.lt.u32.totalorder %s2227_s30, %s2783_s3 }
  0x28   :  { %p2233_p4 = pnand %p2231_p3, %p2228_p2 }
  0x2a   :  { %2236 = shalt.err (!%p2233_p4)
}
  0x2b   :  { %s2237_s14 = scalar_lea.vmem %s47_s18, 512  ;;  %p2242_p6 = scmp.lt.s32.totalorder %s47_s18, %s47_s18 }
  0x2c   :  { %p2238_p5 = scmp.ne.s32.totalorder %s47_s18, %s2237_s14  ;;  %p2243_p7 = scmp.lt.s32.totalorder %s2237_s14, %s2237_s14 }
  0x2e   :  { %p2244_p8 = por %p2243_p7, %p2242_p6 }
  0x30   :  { %p2245_p9 = pnand %p2244_p8, %p2238_p5 }
  0x32   :  { %2248 = shalt.err (!%p2245_p9)
}
  0x33   :  { %52 = dma.hbm_to_vmem [thread:$0]  %s2783_s3, 512, %s47_s18, [#allocation9], %s2324_s11, %s2324_s11, %s2325_s12  }
  0x34   :  { %2315 = dma.done.wait [#allocation6], 256  }
  0x35   :  { %2316 = vsyncadd [#allocation6], 4294967040 }
  0x36   :  { %2317 = dma.done.wait [#allocation9], 1024  }
  0x37   :  { %2318 = vsyncadd [#allocation9], 4294966272  ;;  %v2328_v0 = vmov 0.0|0.0   ;;  %vm2329_vm0 = vmmov 0   ;;  %v2330_v1 = vmov 0.0   ;;  %vm68_vm1 = vcmask 261120  }
  0x38   :  { %1982 = vmatprep.subr.bf16.mxu0 %v2328_v0  ;;  %1814 = vmatprep.mubr.msk.f32.mxu0 %vm2329_vm0, %v2330_v1  ;;  %69 = vst.msk [vmem:[#allocation3] sm:$0xff] %vm68_vm1, %v2330_v1  ;;  %70 = vst.msk [vmem:[#allocation4] sm:$0xff] %vm68_vm1, %v2330_v1  ;;  %v2430_v2 = vld [vmem:[#allocation5] sm:$0xff]  ;;  %v71_v3 = vld [vmem:[#allocation8] sm:$0xff]  ;;  %s2331_s3 = smov 64   ;;  %v2332_v19 = vmov 0  }
  0x39   :  { %1988 = vmatprep.subr.bf16.mxu1 %v2328_v0  ;;  %1825 = vmatprep.mubr.msk.f32.mxu1 %vm2329_vm0, %v2330_v1  ;;  %v72_v4 = vld [vmem:[#allocation8 + $0x8] sm:$0xff]  ;;  %v73_v5 = vld [vmem:[#allocation8 + $0x10] sm:$0xff]  ;;  %v74_v6 = vld [vmem:[#allocation8 + $0x18] sm:$0xff]  ;;  %s2333_s18 = smov 32  }
  0x3a   :  { %242 = vrot.lane.b32.xlu0 %v2430_v2, %s2331_s3  ;;  %v2434_v7 = vld [vmem:[#allocation5 + $0x8] sm:$0xff]  ;;  %v2436_v8 = vpack.c.bf16 %v72_v4, %v71_v3  ;;  %v2439_v9 = vpack.c.bf16 %v74_v6, %v73_v5  ;;  %v75_v11 = vld [vmem:[#allocation10] sm:$0xff]  ;;  %v76_v12 = vld [vmem:[#allocation10 + $0x8] sm:$0xff]  ;;  %2117 = vset.pattern.permute.xlu1 %v2332_v19 }
  0x3b   :  { %v2472_v14 = vpack.c.bf16 %v76_v12, %v75_v11  ;;  %v77_v15 = vld [vmem:[#allocation10 + $0x10] sm:$0xff]  ;;  %v78_v16 = vld [vmem:[#allocation10 + $0x18] sm:$0xff]  ;;  %2118 = vset.pattern.permute.xlu0 %v2332_v19  ;;  %v2496_v20 = vld [vmem:[%s2784_s4] ss:$0 sm:$0xff]  ;;  %s2335_s4 = smov [#allocation11]  }
  0x3c   :  { %1984 = vmatpush3.bf16.msra.mxu0 %v2436_v8  ;;  %1990 = vmatpush3.bf16.msra.mxu1 %v2436_v8  ;;  %v2477_v17 = vpack.c.bf16 %v78_v16, %v77_v15  ;;  %v2502_v25 = vld [vmem:[%s2780_s0] sm:$0xff]  ;;  %s2334_s0 = smov 96   ;;  %s1656_s19 = sshll.u32 %s2335_s4, 4  ;;  %s1657_s19 = int_to_ptr.vmem [resolvable:$true] %s1656_s19 }
  0x3d   :  { %1985 = vmatprep.subr.bf16.mxu0 %v2328_v0  ;;  %1991 = vmatprep.subr.bf16.mxu1 %v2328_v0  ;;  %vm1704_vm2 = vcmp.gt.s32.totalorder %v2502_v25, 0  ;;  %vm1707_vm4 = vcmp.gt.s32.totalorder %v2502_v25, 1  ;;  %vm1710_vm6 = vcmp.gt.s32.totalorder %v2502_v25, 2  ;;  %vm1713_vm8 = vcmp.gt.s32.totalorder %v2502_v25, 3  ;;  %s2249_s20 = scalar_lea.vmem %s1657_s19, 256  ;;  %p2254_p11 = scmp.lt.s32.totalorder %s1657_s19, %s1657_s19 }
  0x3e   :  { %548 = vrot.lane.b32.xlu0 %v2434_v7, %s2331_s3  ;;  %v808_v27 = vsel %vm1704_vm2, 1, %v2332_v19  ;;  %v928_v53 = vsel %vm1707_vm4, 1, %v2332_v19  ;;  %v1046_v12 = vsel %vm1710_vm6, 1, %v2332_v19  ;;  %vm1716_vm10 = vcmp.gt.s32.totalorder %v2502_v25, 4  ;;  %p2250_p10 = scmp.ne.s32.totalorder %s1657_s19, %s2249_s20  ;;  %p2255_p12 = scmp.lt.s32.totalorder %s2249_s20, %s2249_s20 }
  0x3f   :  { %v700_v18 = vld [vmem:[#allocation3] sm:$0xff]  ;;  %v701_v26 = vld [vmem:[#allocation4] sm:$0xff]  ;;  %vm1719_vm12 = vcmp.gt.s32.totalorder %v2502_v25, 5  ;;  %vm1722_vm14 = vcmp.gt.s32.totalorder %v2502_v25, 6  ;;  %vm940_vm2 = vcmask 523520   ;;  %vm1172_vm4 = vcmask 1048320  }
  0x40   :  { %1987 = vmatpush3.bf16.msra.mxu0 %v2439_v9  ;;  %1993 = vmatpush3.bf16.msra.mxu1 %v2439_v9  ;;  %p2256_p13 = por %p2255_p12, %p2254_p11 }
  0x41   :  { %1994 = vmatprep.subr.bf16.mxu0 %v2328_v0  ;;  %2000 = vmatprep.subr.bf16.mxu1 %v2328_v0 }
  0x42   :  { %p2257_p0 = pnand %p2256_p13, %p2250_p10 }
  0x43   :  { %1815 = vmatmul.mubr.msk.f32.vlgmr.msra.gmra.mrb[0].mxu0 %vm68_vm1, %v2430_v2 }
  0x44   :  { %1996 = vmatpush3.bf16.msra.mxu0 %v2436_v8  ;;  %1836 = vmatprep.mubr.msk.f32.mxu0 %vm2329_vm0, %v2330_v1 }
  0x45   :  { %1997 = vmatprep.subr.bf16.mxu0 %v2328_v0 }
  0x48   :  { %1999 = vmatpush3.bf16.msra.mxu0 %v2439_v9 }
  0x49   :  { %2006 = vmatprep.subr.bf16.mxu0 %v2328_v0 }
  0xac   :  { %v243_v10 = vpop.permute.xlu0 %242 }
  0xad   :  { %1837 = vmatmul.mubr.msk.f32.vlgmr.msra.gmra.mrb[2].mxu0 %vm68_vm1, %v243_v10 }
  0xae   :  { %2008 = vmatpush3.bf16.msra.mxu0 %v2436_v8  ;;  %1858 = vmatprep.mubr.msk.f32.mxu0 %vm2329_vm0, %v2330_v1 }
  0xaf   :  { %2009 = vmatprep.subr.bf16.mxu0 %v2328_v0 }
  0xb0   :  { %v549_v13 = vpop.permute.xlu0 %548 }
  0xb2   :  { %2011 = vmatpush3.bf16.msra.mxu0 %v2439_v9 }
  0xb3   :  { %2018 = vmatprep.subr.bf16.mxu0 %v2328_v0 }
  0xb5   :  { %1859 = vmatmul.mubr.msk.f32.vlgmr.msra.gmra.mrb[4].mxu0 %vm68_vm1, %v2434_v7 }
  0xb6   :  { %2020 = vmatpush3.bf16.msra.mxu0 %v2436_v8  ;;  %1880 = vmatprep.mubr.msk.f32.mxu0 %vm2329_vm0, %v2330_v1 }
  0xb7   :  { %2021 = vmatprep.subr.bf16.mxu0 %v2328_v0 }
  0xba   :  { %2023 = vmatpush3.bf16.msra.mxu0 %v2439_v9 }
  0xbb   :  { %2030 = vmatprep.subr.bf16.mxu0 %v2328_v0 }
  0xbd   :  { %1881 = vmatmul.mubr.msk.f32.vlgmr.msra.gmra.mrb[6].mxu0 %vm68_vm1, %v549_v13 }
  0xbe   :  { %2032 = vmatpush3.bf16.msra.mxu0 %v2472_v14  ;;  %1902 = vmatprep.mubr.msk.f32.mxu0 %vm2329_vm0, %v2330_v1 }
  0xbf   :  { %2033 = vmatprep.subr.bf16.mxu0 %v2328_v0 }
  0xc2   :  { %2035 = vmatpush3.bf16.msra.mxu0 %v2477_v17 }
  0xc3   :  { %2042 = vmatprep.subr.bf16.mxu0 %v2328_v0 }
  0xc5   :  { %1903 = vmatmul.mubr.msk.f32.vlgmr.msra.gmra.mrb[0].mxu0 %vm68_vm1, %v700_v18 }
  0xc6   :  { %2044 = vmatpush3.bf16.msra.mxu0 %v2472_v14  ;;  %1924 = vmatprep.mubr.msk.f32.mxu0 %vm2329_vm0, %v2330_v1 }
  0xc7   :  { %2045 = vmatprep.subr.bf16.mxu0 %v2328_v0 }
  0xca   :  { %2047 = vmatpush3.bf16.msra.mxu0 %v2477_v17 }
  0xcb   :  { %2054 = vmatprep.subr.bf16.mxu0 %v2328_v0 }
 0x198   :  { %v773_v21 = vpop.f32.mrb[0].mxu0 }
 0x199   :  { %v2078_v22 = vadd.f32 %v2496_v20, %v773_v21  ;;  %v1904_v23 = vpop.f32.mrb[1].mxu0 }
 0x19b   :  { %2119 = vtanh.f32 %v2078_v22  ;;  %v1703_v28 = vmul.f32 -1.442695, %v2078_v22 }
 0x19d   :  { %2121 = vpow2.f32 %v1703_v28 }
 0x1a5   :  { %v2120_v24 = vpop.eup %2119 }
 0x1a6   :  { %791 = vrot.lane.b32.xlu1 %v2120_v24, %s2331_s3 }
 0x1a7   :  { %v2122_v29 = vpop.eup %2121 }
 0x1a8   :  { %v781_v30 = vadd.f32 1.0, %v2122_v29 }
 0x1aa   :  { %786 = vrot.lane.b32.xlu1 %v701_v26, %s2333_s18  ;;  %2123 = vrcp.f32 %v781_v30 }
 0x1ae   :  { %810 = vperm.xlu1 %2117, %v808_v27  }
 0x1b2   :  { %814 = vrot.lane.b32.xlu1 %v700_v18, %s2334_s0 }
 0x1b4   :  { %v2124_v31 = vpop.eup %2123 }
 0x1b6   :  { %319 = vrot.lane.b32.xlu1 %v2430_v2, %s2333_s18 }
 0x1ba   :  { %625 = vrot.lane.b32.xlu1 %v2434_v7, %s2333_s18 }
 0x218   :  { %v792_v32 = vpop.permute.xlu1 %791 }
 0x219   :  { %v794_v33 = vmul.f32 %v2124_v31, %v792_v32 }
 0x21b   :  { %796 = vrot.lane.b32.xlu0 %v794_v33, %s2333_s18 }
 0x21c   :  { %v2514_v34 = vpop.permute.xlu1 %786 }
 0x21d   :  { %v789_v35 = vmul.f32 %v2124_v31, %v2514_v34 }
 0x22d   :  { %v2525_v39 = vpop.permute.xlu1 %810 }
 0x22e   :  { %vm812_vm3 = vcmp.eq.s32.totalorder %v2525_v39, 1 }
 0x231   :  { %v815_v41 = vpop.permute.xlu1 %814 }
 0x235   :  { %v320_v45 = vpop.permute.xlu1 %319 }
 0x239   :  { %v626_v47 = vpop.permute.xlu1 %625 }
 0x28d   :  { %v797_v36 = vpop.permute.xlu0 %796 }
 0x28e   :  { %v2517_v37 = vadd.f32 %v797_v36, %v789_v35 }
 0x290   :  { %2125 = vtanh.f32 %v2517_v37  ;;  %v813_v60 = vsel %vm812_vm3, %v2517_v37, %v2514_v34 }
 0x29a   :  { %v2126_v38 = vpop.eup %2125 }
 0x29b   :  { %802 = vrot.lane.b32.xlu0 %v2126_v38, %s2331_s3  ;;  %v1164_v38 = vsel %vm1713_vm8, 1, %v2332_v19 }
 0x29f   :  { %165 = vrot.lane.b32.xlu0 %v2430_v2, %s2334_s0 }
 0x2a3   :  { %471 = vrot.lane.b32.xlu0 %v2434_v7, %s2334_s0 }
 0x30d   :  { %v803_v40 = vpop.permute.xlu0 %802 }
 0x30e   :  { %v2527_v42 = vmul.f32 %v2124_v31, %v803_v40 }
 0x310   :  { %v2533_v43 = vsel %vm812_vm3, %v2527_v42, %v815_v41 }
 0x311   :  { %826 = vrot.lane.b32.xlu0 %v2533_v43, %s2333_s18  ;;  %v166_v44 = vpop.permute.xlu0 %165 }
 0x312   :  { %1826 = vmatmul.mubr.msk.f32.vlgmr.msra.gmra.mrb[0].mxu1 %vm68_vm1, %v166_v44 }
 0x313   :  { %2002 = vmatpush3.bf16.msra.mxu1 %v2436_v8  ;;  %1847 = vmatprep.mubr.msk.f32.mxu1 %vm2329_vm0, %v2330_v1 }
 0x314   :  { %2003 = vmatprep.subr.bf16.mxu1 %v2328_v0 }
 0x315   :  { %v472_v46 = vpop.permute.xlu0 %471 }
 0x317   :  { %2005 = vmatpush3.bf16.msra.mxu1 %v2439_v9 }
 0x318   :  { %2012 = vmatprep.subr.bf16.mxu1 %v2328_v0 }
 0x31a   :  { %1848 = vmatmul.mubr.msk.f32.vlgmr.msra.gmra.mrb[2].mxu1 %vm68_vm1, %v320_v45 }
 0x31b   :  { %2014 = vmatpush3.bf16.msra.mxu1 %v2436_v8  ;;  %1869 = vmatprep.mubr.msk.f32.mxu1 %vm2329_vm0, %v2330_v1 }
 0x31c   :  { %2015 = vmatprep.subr.bf16.mxu1 %v2328_v0 }
 0x31f   :  { %2017 = vmatpush3.bf16.msra.mxu1 %v2439_v9 }
 0x320   :  { %2024 = vmatprep.subr.bf16.mxu1 %v2328_v0 }
 0x322   :  { %1870 = vmatmul.mubr.msk.f32.vlgmr.msra.gmra.mrb[4].mxu1 %vm68_vm1, %v472_v46 }
 0x323   :  { %2026 = vmatpush3.bf16.msra.mxu1 %v2436_v8  ;;  %1891 = vmatprep.mubr.msk.f32.mxu1 %vm2329_vm0, %v2330_v1 }
 0x324   :  { %2027 = vmatprep.subr.bf16.mxu1 %v2328_v0 }
 0x327   :  { %2029 = vmatpush3.bf16.msra.mxu1 %v2439_v9 }
 0x328   :  { %2036 = vmatprep.subr.bf16.mxu1 %v2328_v0 }
 0x32a   :  { %1892 = vmatmul.mubr.msk.f32.vlgmr.msra.gmra.mrb[6].mxu1 %vm68_vm1, %v626_v47 }
 0x32b   :  { %2038 = vmatpush3.bf16.msra.mxu1 %v2472_v14  ;;  %1913 = vmatprep.mubr.msk.f32.mxu1 %vm2329_vm0, %v2330_v1 }
 0x32c   :  { %2039 = vmatprep.subr.bf16.mxu1 %v2328_v0 }
 0x32f   :  { %2041 = vmatpush3.bf16.msra.mxu1 %v2477_v17 }
 0x330   :  { %2048 = vmatprep.subr.bf16.mxu1 %v2328_v0 }
 0x383   :  { %v827_v48 = vpop.permute.xlu0 %826 }
 0x384   :  { %1914 = vmatmul.mubr.msk.f32.vlgmr.msra.gmra.mrb[0].mxu1 %vm68_vm1, %v827_v48 }
 0x385   :  { %2050 = vmatpush3.bf16.msra.mxu1 %v2472_v14  ;;  %1935 = vmatprep.mubr.msk.f32.mxu1 %vm2329_vm0, %v2330_v1 }
 0x386   :  { %2051 = vmatprep.subr.bf16.mxu1 %v2328_v0 }
 0x389   :  { %2053 = vmatpush3.bf16.msra.mxu1 %v2477_v17 }
 0x38a   :  { %2060 = vmatprep.subr.bf16.mxu1 %v2328_v0 }
 0x457   :  { %v896_v49 = vpop.f32.mrb[0].mxu1 }
 0x458   :  { %v2079_v50 = vadd.f32 %v2496_v20, %v896_v49  ;;  %v1915_v51 = vpop.f32.mrb[1].mxu1 }
 0x45a   :  { %2127 = vtanh.f32 %v2079_v50  ;;  %v1706_v54 = vmul.f32 -1.442695, %v2079_v50 }
 0x45c   :  { %2129 = vpow2.f32 %v1706_v54 }
 0x464   :  { %v2128_v52 = vpop.eup %2127 }
 0x465   :  { %910 = vrot.lane.b32.xlu1 %v2128_v52, %s2331_s3 }
 0x466   :  { %v2130_v55 = vpop.eup %2129 }
 0x467   :  { %v904_v56 = vadd.f32 1.0, %v2130_v55 }
 0x469   :  { %930 = vperm.xlu1 %2117, %v928_v53   ;;  %2131 = vrcp.f32 %v904_v56 }
 0x473   :  { %v2132_v57 = vpop.eup %2131 }
 0x474   :  { %v908_v61 = vmul.f32 %v2132_v57, %v813_v60 }
 0x4d7   :  { %v911_v58 = vpop.permute.xlu1 %910 }
 0x4d8   :  { %v913_v59 = vmul.f32 %v2132_v57, %v911_v58 }
 0x4da   :  { %915 = vrot.lane.b32.xlu0 %v913_v59, %s2333_s18 }
 0x4e8   :  { %v2582_v3 = vpop.permute.xlu1 %930 }
 0x4e9   :  { %vm932_vm5 = vcmp.eq.s32.totalorder %v2582_v3, 1 }
 0x54c   :  { %v916_v62 = vpop.permute.xlu0 %915 }
 0x54d   :  { %v918_v63 = vadd.f32 %v916_v62, %v908_v61  ;;  %v1278_v61 = vsel %vm1716_vm10, 1, %v2332_v19 }
 0x54f   :  { %2133 = vtanh.f32 %v918_v63  ;;  %v933_v23 = vsel %vm932_vm5, %v918_v63, %v813_v60 }
 0x559   :  { %v2134_v2 = vpop.eup %2133 }
 0x55a   :  { %921 = vrot.lane.b32.xlu0 %v2134_v2, %s2331_s3 }
 0x5cc   :  { %v922_v4 = vpop.permute.xlu0 %921 }
 0x5cd   :  { %v2584_v5 = vmul.f32 %v2132_v57, %v922_v4 }
 0x5cf   :  { %v934_v6 = vsel %vm932_vm5, %v2584_v5, %v2533_v43 }
 0x5d0   :  { %944 = vrot.lane.b32.xlu1 %v934_v6, %s2333_s18 }
 0x642   :  { %v945_v7 = vpop.permute.xlu1 %944 }
 0x643   :  { %1925 = vmatmul.mubr.msk.f32.vlgmr.msra.gmra.mrb[2].mxu0 %vm68_vm1, %v945_v7 }
 0x644   :  { %2056 = vmatpush3.bf16.msra.mxu0 %v2472_v14  ;;  %1946 = vmatprep.mubr.msk.f32.mxu0 %vm2329_vm0, %v2330_v1 }
 0x645   :  { %2057 = vmatprep.subr.bf16.mxu0 %v2328_v0 }
 0x648   :  { %2059 = vmatpush3.bf16.msra.mxu0 %v2477_v17 }
 0x649   :  { %2066 = vmatprep.subr.bf16.mxu0 %v2328_v0 }
 0x716   :  { %v1014_v8 = vpop.f32.mrb[2].mxu0 }
 0x717   :  { %v2080_v9 = vadd.f32 %v2496_v20, %v1014_v8  ;;  %v1926_v10 = vpop.f32.mrb[3].mxu0 }
 0x719   :  { %2135 = vtanh.f32 %v2080_v9  ;;  %v1709_v13 = vmul.f32 -1.442695, %v2080_v9 }
 0x71b   :  { %2137 = vpow2.f32 %v1709_v13 }
 0x723   :  { %v2136_v11 = vpop.eup %2135 }
 0x724   :  { %1028 = vrot.lane.b32.xlu0 %v2136_v11, %s2331_s3 }
 0x725   :  { %v2138_v15 = vpop.eup %2137 }
 0x726   :  { %v1022_v16 = vadd.f32 1.0, %v2138_v15 }
 0x728   :  { %1048 = vperm.xlu0 %2118, %v1046_v12   ;;  %2139 = vrcp.f32 %v1022_v16 }
 0x732   :  { %v2140_v18 = vpop.eup %2139 }
 0x733   :  { %v1026_v24 = vmul.f32 %v2140_v18, %v933_v23 }
 0x796   :  { %v1029_v21 = vpop.permute.xlu0 %1028 }
 0x797   :  { %v1031_v22 = vmul.f32 %v2140_v18, %v1029_v21 }
 0x799   :  { %1033 = vrot.lane.b32.xlu1 %v1031_v22, %s2333_s18 }
 0x7a7   :  { %v2607_v29 = vpop.permute.xlu0 %1048 }
 0x7a8   :  { %vm1050_vm7 = vcmp.eq.s32.totalorder %v2607_v29, 1 }
 0x80b   :  { %v1034_v26 = vpop.permute.xlu1 %1033 }
 0x80c   :  { %v1036_v27 = vadd.f32 %v1034_v26, %v1026_v24 }
 0x80e   :  { %2141 = vtanh.f32 %v1036_v27  ;;  %v1051_v47 = vsel %vm1050_vm7, %v1036_v27, %v933_v23  ;;  %v1395_v27 = vsel %vm1719_vm12, 1, %v2332_v19 }
 0x818   :  { %v2142_v28 = vpop.eup %2141 }
 0x819   :  { %1039 = vrot.lane.b32.xlu1 %v2142_v28, %s2331_s3 }
 0x88b   :  { %v1040_v30 = vpop.permute.xlu1 %1039 }
 0x88c   :  { %v2609_v31 = vmul.f32 %v2140_v18, %v1040_v30 }
 0x88e   :  { %v1052_v32 = vsel %vm1050_vm7, %v2609_v31, %v934_v6 }
 0x88f   :  { %1062 = vrot.lane.b32.xlu1 %v1052_v32, %s2333_s18 }
 0x901   :  { %v1063_v33 = vpop.permute.xlu1 %1062 }
 0x902   :  { %1936 = vmatmul.mubr.msk.f32.vlgmr.msra.gmra.mrb[2].mxu1 %vm68_vm1, %v1063_v33 }
 0x903   :  { %2062 = vmatpush3.bf16.msra.mxu1 %v2472_v14  ;;  %1957 = vmatprep.mubr.msk.f32.mxu1 %vm2329_vm0, %v2330_v1 }
 0x904   :  { %2063 = vmatprep.subr.bf16.mxu1 %v2328_v0 }
 0x907   :  { %2065 = vmatpush3.bf16.msra.mxu1 %v2477_v17 }
 0x908   :  { %2072 = vmatprep.subr.bf16.mxu1 %v2328_v0 }
 0x9d5   :  { %v1132_v34 = vpop.f32.mrb[2].mxu1 }
 0x9d6   :  { %v2081_v35 = vadd.f32 %v2496_v20, %v1132_v34  ;;  %v1937_v36 = vpop.f32.mrb[3].mxu1 }
 0x9d8   :  { %2143 = vtanh.f32 %v2081_v35  ;;  %v1712_v40 = vmul.f32 -1.442695, %v2081_v35 }
 0x9da   :  { %2145 = vpow2.f32 %v1712_v40 }
 0x9e2   :  { %v2144_v37 = vpop.eup %2143 }
 0x9e3   :  { %1146 = vrot.lane.b32.xlu0 %v2144_v37, %s2331_s3 }
 0x9e4   :  { %v2146_v41 = vpop.eup %2145 }
 0x9e5   :  { %v1140_v43 = vadd.f32 1.0, %v2146_v41 }
 0x9e7   :  { %1166 = vperm.xlu0 %2118, %v1164_v38   ;;  %2147 = vrcp.f32 %v1140_v43 }
 0x9f1   :  { %v2148_v44 = vpop.eup %2147 }
 0x9f2   :  { %v1144_v48 = vmul.f32 %v2148_v44, %v1051_v47 }
 0xa55   :  { %v1147_v45 = vpop.permute.xlu0 %1146 }
 0xa56   :  { %v1149_v46 = vmul.f32 %v2148_v44, %v1147_v45 }
 0xa58   :  { %1151 = vrot.lane.b32.xlu1 %v1149_v46, %s2333_s18 }
 0xa66   :  { %v2631_v52 = vpop.permute.xlu0 %1166 }
 0xa67   :  { %vm1168_vm9 = vcmp.eq.s32.totalorder %v2631_v52, 1 }
 0xaca   :  { %v1152_v49 = vpop.permute.xlu1 %1151 }
 0xacb   :  { %v1154_v50 = vadd.f32 %v1152_v49, %v1144_v48  ;;  %v1512_v48 = vsel %vm1722_vm14, 1, %v2332_v19 }
 0xacd   :  { %2149 = vtanh.f32 %v1154_v50  ;;  %v1169_v8 = vsel %vm1168_vm9, %v1154_v50, %v1051_v47 }
 0xad7   :  { %v2150_v51 = vpop.eup %2149 }
 0xad8   :  { %1157 = vrot.lane.b32.xlu1 %v2150_v51, %s2331_s3 }
 0xb4a   :  { %v1158_v53 = vpop.permute.xlu1 %1157 }
 0xb4b   :  { %v2633_v54 = vmul.f32 %v2148_v44, %v1158_v53 }
 0xb4d   :  { %v1170_v55 = vsel %vm1168_vm9, %v2633_v54, %v1052_v32 }
 0xb4e   :  { %1176 = vrot.lane.b32.xlu0 %v1170_v55, %s2333_s18 }
 0xbc0   :  { %v1177_v56 = vpop.permute.xlu0 %1176 }
 0xbc1   :  { %1947 = vmatmul.mubr.msk.f32.vlgmr.msra.gmra.mrb[4].mxu0 %vm68_vm1, %v1177_v56 }
 0xbc2   :  { %2068 = vmatpush3.bf16.msra.mxu0 %v2472_v14  ;;  %1968 = vmatprep.mubr.msk.f32.mxu0 %vm2329_vm0, %v2330_v1 }
 0xbc3   :  { %2069 = vmatprep.subr.bf16.mxu0 %v2328_v0 }
 0xbc6   :  { %2071 = vmatpush3.bf16.msra.mxu0 %v2477_v17 }
 0xc94   :  { %v1246_v57 = vpop.f32.mrb[4].mxu0 }
 0xc95   :  { %v2082_v58 = vadd.f32 %v2496_v20, %v1246_v57  ;;  %v1948_v59 = vpop.f32.mrb[5].mxu0 }
 0xc97   :  { %2151 = vtanh.f32 %v2082_v58  ;;  %v1715_v62 = vmul.f32 -1.442695, %v2082_v58 }
 0xc99   :  { %2153 = vpow2.f32 %v1715_v62 }
 0xca1   :  { %v2152_v60 = vpop.eup %2151 }
 0xca2   :  { %1260 = vrot.lane.b32.xlu1 %v2152_v60, %s2331_s3 }
 0xca3   :  { %v2154_v63 = vpop.eup %2153 }
 0xca4   :  { %v1254_v2 = vadd.f32 1.0, %v2154_v63 }
 0xca6   :  { %1280 = vperm.xlu1 %2117, %v1278_v61   ;;  %2155 = vrcp.f32 %v1254_v2 }
 0xcb0   :  { %v2156_v4 = vpop.eup %2155 }
 0xcb1   :  { %v1258_v9 = vmul.f32 %v2156_v4, %v1169_v8 }
 0xd14   :  { %v1261_v6 = vpop.permute.xlu1 %1260 }
 0xd15   :  { %v1263_v7 = vmul.f32 %v2156_v4, %v1261_v6 }
 0xd17   :  { %1265 = vrot.lane.b32.xlu0 %v1263_v7, %s2333_s18 }
 0xd25   :  { %v2654_v13 = vpop.permute.xlu1 %1280 }
 0xd26   :  { %vm1282_vm11 = vcmp.eq.s32.totalorder %v2654_v13, 1 }
 0xd89   :  { %v1266_v10 = vpop.permute.xlu0 %1265 }
 0xd8a   :  { %v1268_v11 = vadd.f32 %v1266_v10, %v1258_v9 }
 0xd8c   :  { %2157 = vtanh.f32 %v1268_v11  ;;  %v1283_v32 = vsel %vm1282_vm11, %v1268_v11, %v1169_v8 }
 0xd96   :  { %v2158_v12 = vpop.eup %2157 }
 0xd97   :  { %1271 = vrot.lane.b32.xlu0 %v2158_v12, %s2331_s3  ;;  %v818_v12 = vsel %vm812_vm3, %v2527_v42, 0.0  ;;  %vm1058_vm3 = vcmask 785920  }
 0xe09   :  { %v1272_v15 = vpop.permute.xlu0 %1271 }
 0xe0a   :  { %v2656_v16 = vmul.f32 %v2156_v4, %v1272_v15 }
 0xe0c   :  { %v1284_v18 = vsel %vm1282_vm11, %v2656_v16, %v1170_v55 }
 0xe0d   :  { %1293 = vrot.lane.b32.xlu1 %v1284_v18, %s2333_s18 }
 0xe7f   :  { %v1294_v21 = vpop.permute.xlu1 %1293 }
 0xe80   :  { %1958 = vmatmul.mubr.msk.f32.vlgmr.msra.gmra.mrb[4].mxu1 %vm68_vm1, %v1294_v21 }
 0xe81   :  { %2074 = vmatpush3.bf16.msra.mxu1 %v2472_v14  ;;  %1979 = vmatprep.mubr.msk.f32.mxu1 %vm2329_vm0, %v2330_v1  ;;  %vm1725_vm0 = vcmp.gt.s32.totalorder %v2502_v25, 7  ;;  %v1053_v25 = vsel %vm1050_vm7, %v2609_v31, 0.0  ;;  %v1171_v31 = vsel %vm1168_vm9, %v2633_v54, 0.0 }
 0xe82   :  { %2075 = vmatprep.subr.bf16.mxu1 %v2328_v0  ;;  %v1629_v11 = vsel %vm1725_vm0, 1, %v2332_v19 }
 0xe85   :  { %2077 = vmatpush3.bf16.msra.mxu1 %v2477_v17 }
 0xf53   :  { %v1363_v22 = vpop.f32.mrb[4].mxu1 }
 0xf54   :  { %v2083_v23 = vadd.f32 %v2496_v20, %v1363_v22  ;;  %v1959_v24 = vpop.f32.mrb[5].mxu1 }
 0xf56   :  { %2159 = vtanh.f32 %v2083_v23  ;;  %v1718_v14 = vmul.f32 -1.442695, %v2083_v23 }
 0xf58   :  { %2161 = vpow2.f32 %v1718_v14 }
 0xf60   :  { %v2160_v26 = vpop.eup %2159 }
 0xf61   :  { %1377 = vrot.lane.b32.xlu0 %v2160_v26, %s2331_s3 }
 0xf62   :  { %v2162_v1 = vpop.eup %2161 }
 0xf63   :  { %v1371_v28 = vadd.f32 1.0, %v2162_v1  ;;  %v1285_v1 = vsel %vm1282_vm11, %v2656_v16, 0.0 }
 0xf65   :  { %1397 = vperm.xlu0 %2118, %v1395_v27   ;;  %2163 = vrcp.f32 %v1371_v28 }
 0xf6f   :  { %v2164_v0 = vpop.eup %2163 }
 0xf70   :  { %v1375_v33 = vmul.f32 %v2164_v0, %v1283_v32 }
 0xfd3   :  { %v1378_v17 = vpop.permute.xlu0 %1377 }
 0xfd4   :  { %v1380_v30 = vmul.f32 %v2164_v0, %v1378_v17 }
 0xfd6   :  { %1382 = vrot.lane.b32.xlu1 %v1380_v30, %s2333_s18 }
 0xfe4   :  { %v2677_v37 = vpop.permute.xlu0 %1397 }
 0xfe5   :  { %vm1399_vm13 = vcmp.eq.s32.totalorder %v2677_v37, 1 }
0x1048   :  { %v1383_v34 = vpop.permute.xlu1 %1382 }
0x1049   :  { %v1385_v35 = vadd.f32 %v1383_v34, %v1375_v33 }
0x104b   :  { %2165 = vtanh.f32 %v1385_v35  ;;  %v1400_v57 = vsel %vm1399_vm13, %v1385_v35, %v1283_v32 }
0x1055   :  { %v2166_v36 = vpop.eup %2165 }
0x1056   :  { %1388 = vrot.lane.b32.xlu1 %v2166_v36, %s2331_s3 }
0x10c8   :  { %v1389_v38 = vpop.permute.xlu1 %1388 }
0x10c9   :  { %v2679_v40 = vmul.f32 %v2164_v0, %v1389_v38 }
0x10cb   :  { %v1401_v41 = vsel %vm1399_vm13, %v2679_v40, %v1284_v18  ;;  %v1402_v52 = vsel %vm1399_vm13, %v2679_v40, 0.0 }
0x10cc   :  { %1410 = vrot.lane.b32.xlu0 %v1401_v41, %s2333_s18 }
0x113e   :  { %v1411_v43 = vpop.permute.xlu0 %1410 }
0x113f   :  { %1969 = vmatmul.mubr.msk.f32.vlgmr.msra.gmra.mrb[6].mxu0 %vm68_vm1, %v1411_v43 }
0x1212   :  { %v1480_v44 = vpop.f32.mrb[6].mxu0 }
0x1213   :  { %v2084_v45 = vadd.f32 %v2496_v20, %v1480_v44  ;;  %v1970_v46 = vpop.f32.mrb[7].mxu0 }
0x1215   :  { %2167 = vtanh.f32 %v2084_v45  ;;  %v1721_v49 = vmul.f32 -1.442695, %v2084_v45 }
0x1217   :  { %2169 = vpow2.f32 %v1721_v49 }
0x121f   :  { %v2168_v47 = vpop.eup %2167 }
0x1220   :  { %1494 = vrot.lane.b32.xlu1 %v2168_v47, %s2331_s3 }
0x1221   :  { %v2170_v50 = vpop.eup %2169 }
0x1222   :  { %v1488_v51 = vadd.f32 1.0, %v2170_v50 }
0x1224   :  { %1514 = vperm.xlu1 %2117, %v1512_v48   ;;  %2171 = vrcp.f32 %v1488_v51 }
0x122e   :  { %v2172_v53 = vpop.eup %2171 }
0x122f   :  { %v1492_v58 = vmul.f32 %v2172_v53, %v1400_v57 }
0x1292   :  { %v1495_v55 = vpop.permute.xlu1 %1494 }
0x1293   :  { %v1497_v56 = vmul.f32 %v2172_v53, %v1495_v55 }
0x1295   :  { %1499 = vrot.lane.b32.xlu0 %v1497_v56, %s2333_s18 }
0x12a3   :  { %v1515_v62 = vpop.permute.xlu1 %1514 }
0x12a4   :  { %vm1516_vm15 = vcmp.eq.s32.totalorder %v1515_v62, 1 }
0x1307   :  { %v1500_v59 = vpop.permute.xlu0 %1499 }
0x1308   :  { %v1502_v60 = vadd.f32 %v1500_v59, %v1492_v58 }
0x130a   :  { %2173 = vtanh.f32 %v1502_v60  ;;  %v1517_v23 = vsel %vm1516_vm15, %v1502_v60, %v1400_v57 }
0x1314   :  { %v2174_v61 = vpop.eup %2173 }
0x1315   :  { %1505 = vrot.lane.b32.xlu0 %v2174_v61, %s2331_s3 }
0x1387   :  { %v1506_v63 = vpop.permute.xlu0 %1505 }
0x1388   :  { %v1508_v2 = vmul.f32 %v2172_v53, %v1506_v63 }
0x138a   :  { %v1518_v4 = vsel %vm1516_vm15, %v1508_v2, %v1401_v41  ;;  %v1519_v54 = vsel %vm1516_vm15, %v1508_v2, 0.0 }
0x138b   :  { %1527 = vrot.lane.b32.xlu1 %v1518_v4, %s2333_s18 }
0x13fd   :  { %v1528_v6 = vpop.permute.xlu1 %1527 }
0x13fe   :  { %1980 = vmatmul.mubr.msk.f32.vlgmr.msra.gmra.mrb[6].mxu1 %vm68_vm1, %v1528_v6 }
0x14d1   :  { %v1597_v7 = vpop.f32.mrb[6].mxu1 }
0x14d2   :  { %v2085_v8 = vadd.f32 %v2496_v20, %v1597_v7  ;;  %v1981_v9 = vpop.f32.mrb[7].mxu1  ;;  %v935_v20 = vsel %vm932_vm5, %v2584_v5, 0.0 }
0x14d4   :  { %2175 = vtanh.f32 %v2085_v8  ;;  %v1724_v19 = vmul.f32 -1.442695, %v2085_v8 }
0x14d6   :  { %2177 = vpow2.f32 %v1724_v19 }
0x14de   :  { %v2176_v10 = vpop.eup %2175 }
0x14df   :  { %1611 = vrot.lane.b32.xlu0 %v2176_v10, %s2331_s3 }
0x14e0   :  { %v2178_v15 = vpop.eup %2177 }
0x14e1   :  { %v1605_v18 = vadd.f32 1.0, %v2178_v15 }
0x14e3   :  { %1631 = vperm.xlu0 %2118, %v1629_v11   ;;  %2179 = vrcp.f32 %v1605_v18 }
0x14e7   :  { %820 = vrot.lane.b32.xlu0 %v818_v12, %s2333_s18 }
0x14eb   :  { %937 = vrot.lane.b32.xlu0 %v935_v20, %s2331_s3 }
0x14ed   :  { %v2180_v39 = vpop.eup %2179 }
0x14ee   :  { %v1609_v24 = vmul.f32 %v2180_v39, %v1517_v23 }
0x14ef   :  { %1055 = vrot.lane.b32.xlu0 %v1053_v25, %s2334_s0 }
0x1551   :  { %v1612_v42 = vpop.permute.xlu0 %1611 }
0x1552   :  { %v1614_v21 = vmul.f32 %v2180_v39, %v1612_v42 }
0x1554   :  { %1616 = vrot.lane.b32.xlu1 %v1614_v21, %s2333_s18 }
0x1562   :  { %v1632_v3 = vpop.permute.xlu0 %1631 }
0x1563   :  { %vm1633_vm5 = vcmp.eq.s32.totalorder %v1632_v3, 1 }
0x1566   :  { %v821_v5 = vpop.permute.xlu0 %820 }
0x1567   :  { %823 = vst.msk [vmem:[#allocation11] sm:$0xff] %vm68_vm1, %v821_v5 }
0x156a   :  { %v938_v22 = vpop.permute.xlu0 %937 }
0x156b   :  { %941 = vst.msk [vmem:[#allocation11] sm:$0xff] %vm940_vm2, %v938_v22 }
0x156e   :  { %v1056_v29 = vpop.permute.xlu0 %1055 }
0x156f   :  { %1059 = vst.msk [vmem:[#allocation11] sm:$0xff] %vm1058_vm3, %v1056_v29 }
0x1570   :  { %1173 = vst.msk [vmem:[#allocation11] sm:$0xff] %vm1172_vm4, %v1171_v31 }
0x15c6   :  { %v1617_v26 = vpop.permute.xlu1 %1616 }
0x15c7   :  { %v1619_v27 = vadd.f32 %v1617_v26, %v1609_v24 }
0x15c9   :  { %2181 = vtanh.f32 %v1619_v27  ;;  %v1634_v28 = vsel %vm1633_vm5, %v1619_v27, %v1517_v23 }
0x15d3   :  { %v2182_v14 = vpop.eup %2181 }
0x15d4   :  { %1622 = vrot.lane.b32.xlu1 %v2182_v14, %s2331_s3 }
0x15d8   :  { %1287 = vrot.lane.b32.xlu1 %v1285_v1, %s2333_s18 }
0x15dc   :  { %1404 = vrot.lane.b32.xlu1 %v1402_v52, %s2331_s3 }
0x15e0   :  { %1521 = vrot.lane.b32.xlu1 %v1519_v54, %s2334_s0 }
0x15e4   :  { %1644 = vrot.lane.b32.xlu1 %v1634_v28, %s2334_s0 }
0x1646   :  { %v1623_v0 = vpop.permute.xlu1 %1622 }
0x1647   :  { %v1625_v17 = vmul.f32 %v2180_v39, %v1623_v0 }
0x1649   :  { %v1635_v13 = vsel %vm1633_vm5, %v1625_v17, %v1518_v4  ;;  %v1636_v33 = vsel %vm1633_vm5, %v1625_v17, 0.0 }
0x164a   :  { %1639 = vrot.lane.b32.xlu0 %v1635_v13, %s2333_s18  ;;  %v1288_v16 = vpop.permute.xlu1 %1287 }
0x164b   :  { %1290 = vst.msk [vmem:[#allocation11 + $0x8] sm:$0xff] %vm68_vm1, %v1288_v16 }
0x164e   :  { %v1405_v30 = vpop.permute.xlu1 %1404 }
0x164f   :  { %1407 = vst.msk [vmem:[#allocation11 + $0x8] sm:$0xff] %vm940_vm2, %v1405_v30 }
0x1652   :  { %v1522_v32 = vpop.permute.xlu1 %1521 }
0x1653   :  { %1524 = vst.msk [vmem:[#allocation11 + $0x8] sm:$0xff] %vm1058_vm3, %v1522_v32 }
0x1654   :  { %1637 = vst.msk [vmem:[#allocation11 + $0x8] sm:$0xff] %vm1172_vm4, %v1636_v33 }
0x1655   :  { %2260 = shalt.err (!%p2257_p0)
}
0x1656   :  { %s2261_s23 = scalar_lea.hbm %s2785_s5, 256 }
0x1657   :  { %p2262_p1 = scmp.ne.s32.totalorder %s2785_s5, %s2261_s23  ;;  %p2265_p2 = scmp.lt.u32.totalorder %s2261_s23, %s2785_s5 }
0x1659   :  { %p2267_p3 = pnand %p2265_p2, %p2262_p1 }
0x165b   :  { %2270 = shalt.err (!%p2267_p3)
}
0x165c   :  { %1659 = dma.vmem_to_hbm [thread:$0]  %s1657_s19, 256, %s2785_s5, [#allocation7]   ;;  %v1645_v34 = vpop.permute.xlu1 %1644 }
0x165d   :  { %1647 = vst.msk [vmem:[#allocation4] sm:$0xff] %vm68_vm1, %v1645_v34  ;;  %1649 = vst.msk [vmem:[#allocation14] sm:$0xff] %vm68_vm1, %v1645_v34  ;;  %s2336_s29 = smov [#allocation12]   ;;  %s2337_s8 = smov [#allocation14]  }
0x165e   :  { %s1666_s30 = sshll.u32 %s2336_s29, 4  ;;  %s1676_s9 = sshll.u32 %s2337_s8, 4  ;;  %s1667_s30 = int_to_ptr.vmem [resolvable:$true] %s1666_s30  ;;  %s1677_s9 = int_to_ptr.vmem [resolvable:$true] %s1676_s9 }
0x165f   :  { %s2271_s10 = scalar_lea.vmem %s1667_s30, 128  ;;  %p2276_p5 = scmp.lt.s32.totalorder %s1667_s30, %s1667_s30 }
0x1660   :  { %p2272_p4 = scmp.ne.s32.totalorder %s1667_s30, %s2271_s10  ;;  %p2277_p6 = scmp.lt.s32.totalorder %s2271_s10, %s2271_s10 }
0x1662   :  { %p2278_p7 = por %p2277_p6, %p2276_p5 }
0x1664   :  { %p2279_p8 = pnand %p2278_p7, %p2272_p4 }
0x16bc   :  { %v1640_v35 = vpop.permute.xlu0 %1639 }
0x16bd   :  { %1642 = vst.msk [vmem:[#allocation3] sm:$0xff] %vm68_vm1, %v1640_v35  ;;  %1648 = vst.msk [vmem:[#allocation12] sm:$0xff] %vm68_vm1, %v1640_v35 }
0x16be   :  { %2282 = shalt.err (!%p2279_p8)
}
0x16bf   :  { %s2283_s14 = scalar_lea.hbm %s2786_s6, 128 }
0x16c0   :  { %p2284_p9 = scmp.ne.s32.totalorder %s2786_s6, %s2283_s14  ;;  %p2287_p10 = scmp.lt.u32.totalorder %s2283_s14, %s2786_s6 }
0x16c2   :  { %p2289_p11 = pnand %p2287_p10, %p2284_p9 }
0x16c4   :  { %2292 = shalt.err (!%p2289_p11)
}
0x16c5   :  { %1669 = dma.vmem_to_hbm [thread:$0]  %s1667_s30, 128, %s2786_s6, [#allocation13]  }
0x16c6   :  { %s2293_s17 = scalar_lea.vmem %s1677_s9, 128  ;;  %p2298_p13 = scmp.lt.s32.totalorder %s1677_s9, %s1677_s9 }
0x16c7   :  { %p2294_p12 = scmp.ne.s32.totalorder %s1677_s9, %s2293_s17  ;;  %p2299_p0 = scmp.lt.s32.totalorder %s2293_s17, %s2293_s17 }
0x16c9   :  { %p2300_p1 = por %p2299_p0, %p2298_p13 }
0x16cb   :  { %p2301_p2 = pnand %p2300_p1, %p2294_p12 }
0x16cd   :  { %2304 = shalt.err (!%p2301_p2)
}
0x16ce   :  { %s2305_s4 = scalar_lea.hbm %s2787_s7, 128 }
0x16cf   :  { %p2306_p3 = scmp.ne.s32.totalorder %s2787_s7, %s2305_s4  ;;  %p2309_p4 = scmp.lt.u32.totalorder %s2305_s4, %s2787_s7 }
0x16d1   :  { %p2311_p5 = pnand %p2309_p4, %p2306_p3 }
0x16d3   :  { %2314 = shalt.err (!%p2311_p5)
}
0x16d4   :  { %1679 = dma.vmem_to_hbm [thread:$0]  %s1677_s9, 128, %s2787_s7, [#allocation13]  }
0x16d5   :  { %2319 = dma.done.wait [#allocation7], 256  }
0x16d6   :  { %2320 = vsyncadd [#allocation7], 4294967040 }
0x16d7   :  { %2321 = dma.done.wait [#allocation13], 256  }
0x16d8   :  { %2322 = vsyncadd [#allocation13], 4294967040 }
0x16d9   :  { %1689 = vsyncpa [#allocation6], 1 }
0x16da   :  { %1690 = vsyncpa [#allocation9], 1 }
0x16db   :  { %1691 = vsyncpa [#allocation7], 1 }
0x16dc   :  { %1692 = vsyncpa [#allocation13], 1 }

</bundles_post_ra>
